<compile_context>
chip_gen: v6e
topology: v6e:2x2x1
jax: 0.10.0
libtpu: 0.0.40
codegen_flags: <defaults>
</compile_context>

<pallas_src>
import functools

import jax
import jax.numpy as jnp
from jax import lax
from jax.experimental import pallas as pl
from jax.experimental.pallas import tpu as pltpu

EPS = 1e-5
GROWTH = 32
BLOCK_CONFIG = (6, 12, 48, 32)          # DenseNet-201
BN_SIZE = 4
NUM_INIT = 64
NUM_CLASSES = 2
K_CHUNK = 256                            # in-kernel K chunk for the matmul
VMEM_LIMIT = 48 * 1024 * 1024            # fits v5e/v6e (128M) and v7x (64M)

# per dense-block M tiles: (tm for buffer-reading convs, tm3 for the 3x3 conv)
# chosen so every grid has >=2 tiles (keeps both v7x TensorCores busy) while
# the full-K / resident-weight working set stays far below VMEM.
BLOCK_TM = ((512, 512), (256, 256), (128, 128), (64, 64))


def _round_up(x, m):
    return (x + m - 1) // m * m


def _kpad(c, cf):
    # channel-prefix read width for the 1x1 convs: multiple of 256 (fewer
    # distinct kernels / compiles), capped at the (128-multiple) buffer width.
    return min(_round_up(c, 256), cf)


# --------------------------------------------------------------------------
# Pallas kernels
# --------------------------------------------------------------------------
def _fused_matmul_kernel(x_ref, ps_ref, pb_ref, w_ref, es_ref, eb_ref,
                         o_ref, acc_ref, *, prologue, epilogue, relu_out,
                         k_chunk):
    """o = epilogue( prologue(x) @ w ); full K per grid step, chunked inside.

    prologue: relu(x * ps + pb)   (eval-mode BN folded to scale/bias; f32 math,
                                   bf16 operands into the MXU, f32 accumulate)
    epilogue: acc * es + eb [, relu]
    """
    acc_ref[...] = jnp.zeros_like(acc_ref)
    K = x_ref.shape[1]
    for off in range(0, K, k_chunk):                 # static unrolled chunks
        sz = min(k_chunk, K - off)
        a = x_ref[:, off:off + sz]
        if prologue:
            a = jnp.maximum(a.astype(jnp.float32) * ps_ref[:, off:off + sz]
                            + pb_ref[:, off:off + sz], 0.0)
            a = a.astype(jnp.bfloat16)
        acc_ref[...] += jnp.dot(a, w_ref[off:off + sz, :],
                                preferred_element_type=jnp.float32)
    r = acc_ref[...]
    if epilogue:
        r = r * es_ref[...] + eb_ref[...]
        if relu_out:
            r = jnp.maximum(r, 0.0)
    o_ref[...] = r.astype(o_ref.dtype)


def _conv3x3_kernel(x_ref, w_ref, o_ref, acc_ref, *, wp):
    """Implicit-GEMM 3x3 / stride 1 / pad 1 convolution.

    x_ref: full zero-padded, already-activated input flattened to (rows, Cin)
           with row = b*Hp*Wp + i*Wp + j (single VMEM-resident block).
    Output row o (same flat indexing) needs input rows o + di*Wp + dj, so the
    conv is 9 shifted (tm, Cin) @ (Cin, Cout) matmuls accumulated in VMEM.
    Rows with j >= W or i >= H are junk and discarded by the caller.
    """
    tm = o_ref.shape[0]
    cin = x_ref.shape[1]
    base = pl.program_id(0) * tm
    acc_ref[...] = jnp.zeros_like(acc_ref)
    for t in range(9):
        di, dj = divmod(t, 3)
        off = di * wp + dj
        a = x_ref[pl.ds(base + off, tm), :].astype(jnp.bfloat16)
        acc_ref[...] += jnp.dot(a, w_ref[t * cin:(t + 1) * cin, :],
                                preferred_element_type=jnp.float32)
    o_ref[...] = acc_ref[...].astype(o_ref.dtype)


def _head_kernel(x_ref, s_ref, b_ref, w_ref, fb_ref, o_ref):
    # x: (B, 49, 1920) -> relu(norm5(x)) -> mean over the 7x7 window -> fc
    y = jnp.maximum(x_ref[...].astype(jnp.float32) * s_ref[...] + b_ref[...],
                    0.0)
    pooled = jnp.mean(y, axis=1)                                   # (B, C)
    o_ref[...] = jnp.dot(pooled, w_ref[...],
                         preferred_element_type=jnp.float32) + fb_ref[...]


# --------------------------------------------------------------------------
# pallas_call builders (cached per static config)
# --------------------------------------------------------------------------
@functools.lru_cache(maxsize=None)
def _get_matmul_call(Mp, K, N, tm, prologue, epilogue, relu_out,
                     out_dtype_name):
    out_dtype = jnp.dtype(out_dtype_name)
    kernel = functools.partial(_fused_matmul_kernel, prologue=prologue,
                               epilogue=epilogue, relu_out=relu_out,
                               k_chunk=K_CHUNK)
    return pl.pallas_call(
        kernel,
        out_shape=jax.ShapeDtypeStruct((Mp, N), out_dtype),
        grid_spec=pltpu.PrefetchScalarGridSpec(
            num_scalar_prefetch=0,
            grid=(Mp // tm,),
            in_specs=[pl.BlockSpec((tm, K), lambda i: (i, 0)),
                      pl.BlockSpec((1, K), lambda i: (0, 0)),
                      pl.BlockSpec((1, K), lambda i: (0, 0)),
                      pl.BlockSpec((K, N), lambda i: (0, 0)),   # W resident
                      pl.BlockSpec((1, N), lambda i: (0, 0)),
                      pl.BlockSpec((1, N), lambda i: (0, 0))],
            out_specs=pl.BlockSpec((tm, N), lambda i: (i, 0)),
            scratch_shapes=[pltpu.VMEM((tm, N), jnp.float32)]),
        compiler_params=pltpu.CompilerParams(
            dimension_semantics=("parallel",),
            vmem_limit_bytes=VMEM_LIMIT))


def fused_matmul(x, w, *, prologue, epilogue, relu_out, tm, out_dtype):
    """out = epilogue(prologue(x[:, :K]) @ w); x may be wider than K."""
    Mp = x.shape[0]
    K, N = w.shape
    assert Mp % tm == 0 and x.shape[1] >= K
    has_pro, has_epi = prologue is not None, epilogue is not None
    ps, pb = prologue if has_pro else (jnp.zeros((1, K), jnp.float32),) * 2
    es, eb = epilogue if has_epi else (jnp.zeros((1, N), jnp.float32),) * 2
    call = _get_matmul_call(Mp, K, N, tm, has_pro, has_epi, bool(relu_out),
                            jnp.dtype(out_dtype).name)
    return call(x, ps, pb, w, es, eb)


@functools.lru_cache(maxsize=None)
def _get_conv3x3_call(R_in, Cin, Cout, Mp_out, tm, wp):
    return pl.pallas_call(
        functools.partial(_conv3x3_kernel, wp=wp),
        out_shape=jax.ShapeDtypeStruct((Mp_out, Cout), jnp.bfloat16),
        grid_spec=pltpu.PrefetchScalarGridSpec(
            num_scalar_prefetch=0,
            grid=(Mp_out // tm,),
            in_specs=[pl.BlockSpec((R_in, Cin), lambda i: (0, 0)),   # resident
                      pl.BlockSpec((9 * Cin, Cout), lambda i: (0, 0))],
            out_specs=pl.BlockSpec((tm, Cout), lambda i: (i, 0)),
            scratch_shapes=[pltpu.VMEM((tm, Cout), jnp.float32)]),
        compiler_params=pltpu.CompilerParams(
            dimension_semantics=("parallel",),
            vmem_limit_bytes=VMEM_LIMIT))


def conv3x3(x_flat, w, *, wp, mp_out, tm):
    R_in, Cin = x_flat.shape
    return _get_conv3x3_call(R_in, Cin, w.shape[1], mp_out, tm, wp)(x_flat, w)


@functools.lru_cache(maxsize=None)
def _get_head_call(B, HW, C, n_pad):
    return pl.pallas_call(
        _head_kernel,
        out_shape=jax.ShapeDtypeStruct((B, n_pad), jnp.float32),
        grid_spec=pltpu.PrefetchScalarGridSpec(
            num_scalar_prefetch=0,
            grid=(1,),
            in_specs=[pl.BlockSpec((B, HW, C), lambda i: (0, 0, 0)),
                      pl.BlockSpec((1, 1, C), lambda i: (0, 0, 0)),
                      pl.BlockSpec((1, 1, C), lambda i: (0, 0, 0)),
                      pl.BlockSpec((C, n_pad), lambda i: (0, 0)),
                      pl.BlockSpec((1, n_pad), lambda i: (0, 0))],
            out_specs=pl.BlockSpec((B, n_pad), lambda i: (0, 0))),
        compiler_params=pltpu.CompilerParams(
            dimension_semantics=("arbitrary",),
            vmem_limit_bytes=VMEM_LIMIT))


# --------------------------------------------------------------------------
# Stage functions (jitted, cached per static geometry)
# --------------------------------------------------------------------------
def _im2col(x, kh, kw, stride, pad):
    """x: [B,H,W,C] -> patches [B*Ho*Wo, kh*kw*C] (tap-major, channel-minor).
    Only used for the one stride-2 7x7 stem conv."""
    B, H, W, C = x.shape
    if pad:
        x = jnp.pad(x, ((0, 0), (pad, pad), (pad, pad), (0, 0)))
    Ho = (H + 2 * pad - kh) // stride + 1
    Wo = (W + 2 * pad - kw) // stride + 1
    cols = []
    for di in range(kh):
        for dj in range(kw):
            cols.append(x[:, di:di + (Ho - 1) * stride + 1:stride,
                            dj:dj + (Wo - 1) * stride + 1:stride, :])
    patches = jnp.stack(cols, axis=3)                  # [B,Ho,Wo,kh*kw,C]
    return patches.reshape(B * Ho * Wo, kh * kw * C), (B, Ho, Wo)


@functools.lru_cache(maxsize=None)
def _build_stem_fn(tm=512):
    k_stem = _round_up(7 * 7 * 3, 128)                 # 147 -> 256

    def stem_fn(x_nchw, conv0_w, n0_s, n0_b):
        x = jnp.transpose(x_nchw, (0, 2, 3, 1)).astype(jnp.bfloat16)
        patches, (B, Ho, Wo) = _im2col(x, 7, 7, 2, 3)  # (25088, 147)
        patches = jnp.pad(patches, ((0, 0), (0, k_stem - patches.shape[1])))
        # conv0 + norm0 + relu0 fused (BN/ReLU as output epilogue)
        y = fused_matmul(patches, conv0_w, prologue=None,
                         epilogue=(n0_s, n0_b), relu_out=True,
                         tm=tm, out_dtype=jnp.bfloat16)
        y = y.reshape(B, Ho, Wo, NUM_INIT)
        # TODO(synk): 3x3/s2 max-pool kept in plain JAX (windowed pooling has
        # no tidy matmul form); inputs are post-ReLU (>=0) so init=0 is exact.
        y = lax.reduce_window(y, jnp.array(0.0, y.dtype), lax.max,
                              (1, 3, 3, 1), (1, 2, 2, 1),
                              [(0, 0), (1, 1), (1, 1), (0, 0)])
        return y                                       # (B, 56, 56, 64) bf16

    return jax.jit(stem_fn)


@functools.lru_cache(maxsize=None)
def _build_layer_fn(B, H, W, cf, tm, tm3):
    """One dense layer: norm1+relu -> conv1x1 -> norm2+relu -> conv3x3, and
    write the 32 new channels into the block's (donated) feature buffer."""
    M = B * H * W
    Hp, Wp = H + 2, W + 2
    P = B * Hp * Wp
    Mp3 = _round_up(P, tm3)
    R_in = _round_up(Mp3 + 2 * Wp + 2, 8)
    bc = BN_SIZE * GROWTH                              # 128 bottleneck channels

    def layer_fn(buf, c_off, w1, s1, b1, s2, b2, w2):
        # 1x1 bottleneck conv (prologue = norm1+relu, epilogue = norm2+relu)
        act = fused_matmul(buf, w1, prologue=(s1, b1), epilogue=(s2, b2),
                           relu_out=True, tm=tm, out_dtype=jnp.float32)
        # zero-pad spatially and flatten so the 3x3 taps are constant offsets
        a = act[:M].reshape(B, H, W, bc)
        a = jnp.pad(a, ((0, 0), (1, 1), (1, 1), (0, 0)))
        a = a.reshape(P, bc)
        a = jnp.pad(a, ((0, R_in - P), (0, 0)))
        y = conv3x3(a, w2, wp=Wp, mp_out=Mp3, tm=tm3)  # (Mp3, 32) bf16
        y = y[:P].reshape(B, Hp, Wp, GROWTH)[:, :H, :W, :].reshape(M, GROWTH)
        # write new channels into the preallocated block buffer (in place via
        # buffer donation; replaces the old per-layer concatenate).
        return lax.dynamic_update_slice_in_dim(buf, y, c_off, axis=1)

    return jax.jit(layer_fn, donate_argnums=(0,))


@functools.lru_cache(maxsize=None)
def _build_transition_fn(B, H, W, cf, tm):
    M = B * H * W

    def fn(buf, s, b, w):
        t = fused_matmul(buf, w, prologue=(s, b), epilogue=None,
                         relu_out=False, tm=tm, out_dtype=jnp.float32)
        t = t[:M].reshape(B, H, W, cf // 2)
        # TODO(synk): 2x2 average pool kept in plain JAX.
        t = t.reshape(B, H // 2, 2, W // 2, 2, cf // 2).mean(axis=(2, 4))
        return t.astype(jnp.bfloat16)

    return jax.jit(fn)


@functools.lru_cache(maxsize=None)
def _build_head_fn(B, H, W, C, n_pad=128):
    M = B * H * W

    def fn(buf, s, b, fw, fb):
        feats = buf[:M].reshape(B, H * W, C)
        out = _get_head_call(B, H * W, C, n_pad)(feats, s, b, fw, fb)
        return out[:, :NUM_CLASSES]

    return jax.jit(fn)


# --------------------------------------------------------------------------
# Parameter construction (deterministic, synthetic; pre-padded / pre-cast)
# --------------------------------------------------------------------------
def _conv_w(key, kh, kw, cin, cout):
    std = (2.0 / (kh * kw * cin)) ** 0.5
    return std * jax.random.normal(key, (kh, kw, cin, cout), jnp.float32)


def _bn(key, c):
    k1, k2, k3, k4 = jax.random.split(key, 4)
    gamma = 1.0 + 0.1 * jax.random.normal(k1, (c,), jnp.float32)
    beta = 0.1 * jax.random.normal(k2, (c,), jnp.float32)
    mean = 0.1 * jax.random.normal(k3, (c,), jnp.float32)
    var = jax.random.uniform(k4, (c,), jnp.float32, 0.5, 1.5)
    scale = gamma / jnp.sqrt(var + EPS)      # eval-mode BN folded to scale/bias
    bias = beta - mean * scale
    return scale, bias


def init_densenet201_params(key, num_classes=NUM_CLASSES):
    keys = iter(jax.random.split(key, 512))
    k_stem = _round_up(7 * 7 * 3, 128)
    w0 = _conv_w(next(keys), 7, 7, 3, NUM_INIT).reshape(7 * 7 * 3, NUM_INIT)
    params = {'conv0_w': jnp.pad(w0, ((0, k_stem - w0.shape[0]),
                                      (0, 0))).astype(jnp.bfloat16)}
    s, b = _bn(next(keys), NUM_INIT)
    params['norm0_s'] = s.reshape(1, NUM_INIT)
    params['norm0_b'] = b.reshape(1, NUM_INIT)

    c = NUM_INIT
    blocks = []
    for bi, n_layers in enumerate(BLOCK_CONFIG):
        cf = c + GROWTH * n_layers
        layers = []
        for _ in range(n_layers):
            kpad = _kpad(c, cf)
            s1, b1 = _bn(next(keys), c)
            w1 = _conv_w(next(keys), 1, 1, c, BN_SIZE * GROWTH).reshape(
                c, BN_SIZE * GROWTH)
            s2, b2 = _bn(next(keys), BN_SIZE * GROWTH)
            w2 = _conv_w(next(keys), 3, 3, BN_SIZE * GROWTH, GROWTH).reshape(
                9 * BN_SIZE * GROWTH, GROWTH)
            layers.append({
                # scale/bias/weights zero-padded up to the kernel's K read
                # width: padded (still-unwritten) channels give relu(0)=0.
                's1': jnp.pad(s1.reshape(1, c), ((0, 0), (0, kpad - c))),
                'b1': jnp.pad(b1.reshape(1, c), ((0, 0), (0, kpad - c))),
                'w1': jnp.pad(w1, ((0, kpad - c), (0, 0))).astype(jnp.bfloat16),
                's2': s2.reshape(1, BN_SIZE * GROWTH),
                'b2': b2.reshape(1, BN_SIZE * GROWTH),
                'w2': w2.astype(jnp.bfloat16),
            })
            c += GROWTH
        blocks.append(layers)
        if bi != len(BLOCK_CONFIG) - 1:
            s, b = _bn(next(keys), c)
            w = _conv_w(next(keys), 1, 1, c, c // 2).reshape(c, c // 2)
            params[f'trans{bi}'] = {'s': s.reshape(1, c), 'b': b.reshape(1, c),
                                    'w': w.astype(jnp.bfloat16)}
            c //= 2
    params['blocks'] = blocks

    s, b = _bn(next(keys), c)                               # c == 1920
    params['norm5_s'] = s.reshape(1, 1, c)
    params['norm5_b'] = b.reshape(1, 1, c)
    kw_, kb_ = jax.random.split(next(keys))
    fc_w = (1.0 / c) ** 0.5 * jax.random.normal(kw_, (c, num_classes),
                                                jnp.float32)
    fc_b = 0.01 * jax.random.normal(kb_, (num_classes,), jnp.float32)
    params['fc_w'] = jnp.pad(fc_w, ((0, 0), (0, 128 - num_classes)))
    params['fc_b'] = jnp.pad(fc_b.reshape(1, num_classes),
                             ((0, 0), (0, 128 - num_classes)))
    return params


# --------------------------------------------------------------------------
# Forward pass (mirrors Densnet201.forward; returns fc logits)
# --------------------------------------------------------------------------
def densenet201_forward(params, x_nchw):
    # stem: conv0(7x7/s2/p3) + norm0 + relu0 (fused) -> maxpool 3x3/s2/p1
    x = _build_stem_fn()(x_nchw, params['conv0_w'],
                         params['norm0_s'], params['norm0_b'])

    out = None
    for bi, layers in enumerate(params['blocks']):
        tm, tm3 = BLOCK_TM[bi]
        B, H, W, c = x.shape
        M = B * H * W
        cf = c + GROWTH * len(layers)
        Mp = _round_up(M, tm)
        # preallocate the block's final feature buffer once; layers write
        # their 32 new channels into channel slices (no concatenation).
        buf = jnp.zeros((Mp, cf), jnp.bfloat16)
        buf = lax.dynamic_update_slice(buf, x.reshape(M, c), (0, 0))
        layer_fn = _build_layer_fn(B, H, W, cf, tm, tm3)
        for lp in layers:
            buf = layer_fn(buf, c, lp['w1'], lp['s1'], lp['b1'],
                           lp['s2'], lp['b2'], lp['w2'])
            c += GROWTH
        if bi != len(params['blocks']) - 1:
            t = params[f'trans{bi}']
            x = _build_transition_fn(B, H, W, cf, tm)(buf, t['s'], t['b'],
                                                      t['w'])
        else:
            # head: norm5 -> relu -> avg_pool2d(7) -> flatten -> fc
            out = _build_head_fn(B, H, W, cf)(buf, params['norm5_s'],
                                              params['norm5_b'],
                                              params['fc_w'], params['fc_b'])
    return out                                          # (B, num_classes)


# --------------------------------------------------------------------------
if __name__ == "__main__":
    key = jax.random.PRNGKey(0)
    kp, kx = jax.random.split(key)
    params = init_densenet201_params(kp)

    # 224x224 is the minimum spatial size consistent with avg_pool2d(7)+fc(1920)
    x = jax.random.normal(kx, (2, 3, 224, 224), jnp.float32)

    out = densenet201_forward(params, x)
    out = jax.block_until_ready(out)

    assert out.shape == (2, NUM_CLASSES), out.shape
    assert bool(jnp.all(jnp.isfinite(out)))
    print("KERNEL_OK")
</pallas_src>

<mosaic_0001>
module attributes {stable_mosaic.version = 11 : i64} {
  func.func @_fused_matmul_kernel(%arg0: i32, %arg1: memref<512x256xbf16, #tpu.memory_space<vmem>>, %arg2: memref<1x256xf32, #tpu.memory_space<vmem>>, %arg3: memref<1x256xf32, #tpu.memory_space<vmem>>, %arg4: memref<256x64xbf16, #tpu.memory_space<vmem>>, %arg5: memref<1x64xf32, #tpu.memory_space<vmem>>, %arg6: memref<1x64xf32, #tpu.memory_space<vmem>>, %arg7: memref<512x64xbf16, #tpu.memory_space<vmem>>, %arg8: memref<512x64xf32, #tpu.memory_space<vmem>>) attributes {dimension_semantics = [#tpu.dimension_semantics<parallel>], iteration_bounds = array<i64: 49>, scalar_prefetch = 0 : i64, scratch_operands = 1 : i64, tpu.core_type = #tpu.core_type<tc>, window_params = [{transform_indices = @transform_0, window_bounds = array<i64: 512, 256>}, {pipeline_mode = #tpu.pipeline_mode<synchronous>, transform_indices = @transform_1, window_bounds = array<i64: 1, 256>}, {pipeline_mode = #tpu.pipeline_mode<synchronous>, transform_indices = @transform_2, window_bounds = array<i64: 1, 256>}, {pipeline_mode = #tpu.pipeline_mode<synchronous>, transform_indices = @transform_3, window_bounds = array<i64: 256, 64>}, {pipeline_mode = #tpu.pipeline_mode<synchronous>, transform_indices = @transform_4, window_bounds = array<i64: 1, 64>}, {pipeline_mode = #tpu.pipeline_mode<synchronous>, transform_indices = @transform_5, window_bounds = array<i64: 1, 64>}, {transform_indices = @transform_6, window_bounds = array<i64: 512, 64>}]} {
    %cst = arith.constant 0.000000e+00 : f32
    %0 = vector.broadcast %cst : f32 to vector<512x64xf32>
    %c0 = arith.constant 0 : index
    %c0_0 = arith.constant 0 : index
    %1 = vector.load %arg8[%c0, %c0_0] : memref<512x64xf32, #tpu.memory_space<vmem>>, vector<512x64xf32>
    tpu.vector_store %arg8[%c0, %c0_0], %0 {strides = array<i32>} : memref<512x64xf32, #tpu.memory_space<vmem>>, vector<512x64xf32>,
    %c0_1 = arith.constant 0 : index
    %c0_2 = arith.constant 0 : index
    %2 = vector.load %arg1[%c0_1, %c0_2] : memref<512x256xbf16, #tpu.memory_space<vmem>>, vector<512x256xbf16>
    %c0_3 = arith.constant 0 : index
    %c0_4 = arith.constant 0 : index
    %3 = vector.load %arg8[%c0_3, %c0_4] : memref<512x64xf32, #tpu.memory_space<vmem>>, vector<512x64xf32>
    %c0_5 = arith.constant 0 : index
    %c0_6 = arith.constant 0 : index
    %4 = vector.load %arg4[%c0_5, %c0_6] : memref<256x64xbf16, #tpu.memory_space<vmem>>, vector<256x64xbf16>
    %cst_7 = arith.constant dense<0.000000e+00> : vector<512x64xf32>
    %5 = tpu.matmul %2, %4, %cst_7 {dimension_numbers = #tpu.dot_dimension_numbers<[1], [0], [0], [1], [0, 0, 1, 1], [], []>} : vector<512x256xbf16>, vector<256x64xbf16>, vector<512x64xf32> -> vector<512x64xf32>
    %6 = arith.addf %3, %5 : vector<512x64xf32>
    %c0_8 = arith.constant 0 : index
    %c0_9 = arith.constant 0 : index
    %7 = vector.load %arg8[%c0_8, %c0_9] : memref<512x64xf32, #tpu.memory_space<vmem>>, vector<512x64xf32>
    tpu.vector_store %arg8[%c0_8, %c0_9], %6 {strides = array<i32>} : memref<512x64xf32, #tpu.memory_space<vmem>>, vector<512x64xf32>,
    %c0_10 = arith.constant 0 : index
    %c0_11 = arith.constant 0 : index
    %8 = vector.load %arg8[%c0_10, %c0_11] : memref<512x64xf32, #tpu.memory_space<vmem>>, vector<512x64xf32>
    %c0_12 = arith.constant 0 : index
    %c0_13 = arith.constant 0 : index
    %9 = vector.load %arg5[%c0_12, %c0_13] : memref<1x64xf32, #tpu.memory_space<vmem>>, vector<1x64xf32>
    %10 = vector.broadcast %9 : vector<1x64xf32> to vector<512x64xf32>
    %11 = arith.mulf %8, %10 : vector<512x64xf32>
    %c0_14 = arith.constant 0 : index
    %c0_15 = arith.constant 0 : index
    %12 = vector.load %arg6[%c0_14, %c0_15] : memref<1x64xf32, #tpu.memory_space<vmem>>, vector<1x64xf32>
    %13 = vector.broadcast %12 : vector<1x64xf32> to vector<512x64xf32>
    %14 = arith.addf %11, %13 : vector<512x64xf32>
    %cst_16 = arith.constant 0.000000e+00 : f32
    %15 = vector.broadcast %cst_16 : f32 to vector<512x64xf32>
    %16 = arith.maximumf %14, %15 : vector<512x64xf32>
    %17 = arith.truncf %16 : vector<512x64xf32> to vector<512x64xbf16>
    %c0_17 = arith.constant 0 : index
    %c0_18 = arith.constant 0 : index
    %18 = vector.load %arg7[%c0_17, %c0_18] : memref<512x64xbf16, #tpu.memory_space<vmem>>, vector<512x64xbf16>
    tpu.vector_store %arg7[%c0_17, %c0_18], %17 {strides = array<i32>} : memref<512x64xbf16, #tpu.memory_space<vmem>>, vector<512x64xbf16>,
    return
  }
  func.func @transform_0(%arg0: i32) -> (i32, i32) {
    %c0_i32 = arith.constant 0 : i32
    %c0_i32_0 = arith.constant 0 : i32
    return %arg0, %c0_i32 : i32, i32
  }
  func.func @transform_1(%arg0: i32) -> (i32, i32) {
    %c0_i32 = arith.constant 0 : i32
    %c0_i32_0 = arith.constant 0 : i32
    %c0_i32_1 = arith.constant 0 : i32
    return %c0_i32, %c0_i32_0 : i32, i32
  }
  func.func @transform_2(%arg0: i32) -> (i32, i32) {
    %c0_i32 = arith.constant 0 : i32
    %c0_i32_0 = arith.constant 0 : i32
    %c0_i32_1 = arith.constant 0 : i32
    return %c0_i32, %c0_i32_0 : i32, i32
  }
  func.func @transform_3(%arg0: i32) -> (i32, i32) {
    %c0_i32 = arith.constant 0 : i32
    %c0_i32_0 = arith.constant 0 : i32
    %c0_i32_1 = arith.constant 0 : i32
    return %c0_i32, %c0_i32_0 : i32, i32
  }
  func.func @transform_4(%arg0: i32) -> (i32, i32) {
    %c0_i32 = arith.constant 0 : i32
    %c0_i32_0 = arith.constant 0 : i32
    %c0_i32_1 = arith.constant 0 : i32
    return %c0_i32, %c0_i32_0 : i32, i32
  }
  func.func @transform_5(%arg0: i32) -> (i32, i32) {
    %c0_i32 = arith.constant 0 : i32
    %c0_i32_0 = arith.constant 0 : i32
    %c0_i32_1 = arith.constant 0 : i32
    return %c0_i32, %c0_i32_0 : i32, i32
  }
  func.func @transform_6(%arg0: i32) -> (i32, i32) {
    %c0_i32 = arith.constant 0 : i32
    %c0_i32_0 = arith.constant 0 : i32
    return %arg0, %c0_i32 : i32, i32
  }
}

</mosaic_0001>

<bundles_post_ra>
// kernel: stem_fn.1
= control target key start
LH: loop header
LB: loop body
LE: loop exit
PB: predicated region body
PF: predicated region fallthrough
CT: control target
= control target key end

     0   :  { %s2388_s21 = smov 0   ;;  %s3029_s0 = inlined_call_operand.vmem [shape: bf16[25088,256], index: 0, kind: input, shape index: {}]   ;;  %s3030_s1 = inlined_call_operand.vmem [shape: f32[1,256], index: 1, kind: input, shape index: {}, may-alias: {1,2}]   ;;  %s3031_s2 = inlined_call_operand.vmem [shape: f32[1,256], index: 2, kind: input, shape index: {}, may-alias: {1,2}]   ;;  %s3032_s3 = inlined_call_operand.vmem [shape: bf16[256,64], index: 3, kind: input, shape index: {}]   ;;  %s3033_s4 = inlined_call_operand.vmem [shape: f32[1,64], index: 4, kind: input, shape index: {}]   ;;  %s3034_s5 = inlined_call_operand.vmem [shape: f32[1,64], index: 5, kind: input, shape index: {}]   ;;  %s3035_s6 = inlined_call_operand.vmem [shape: bf16[25088,64], index: 6, kind: output, shape index: {}]  }
   0x1 LB: > { %s1964_s1 = sadd.s32 4294967295, %s2349_s21   ;;  %p1968_p0 = scmp.ge.s32.totalorder %s2349_s21, 1  ;;  %s2349_s21 = sphi %s2388_s21, %s16_s21  }
   0x2   : > { %p214_p1 = scmp.lt.s32.totalorder %s2349_s21, 50 }
   0x4   : > { %p215_p2 = pnand %p1968_p0, %p214_p1 }
   0x5   : > { %s1969_s23 = sshll.u32 (!%p215_p2), %s1964_s1, 6 }
   0x6   : > { %218 = sbr.rel (%p215_p2) target bundleno = 413 (0x19d), region = 44  ;;  %p246_p3 = scmp.lt.s32.totalorder (!%p215_p2), %s1969_s23, 3135 }
   0xb   : > { %v2229_v0 = vld [vmem:[%s3032_s3 + $0x38] sm:$0xff]   ;;  %v2351_v1 = vmov 0   ;;  %v2230_v2 = vld [vmem:[%s3032_s3 + $0x30] sm:$0xff]   ;;  %v2231_v3 = vld [vmem:[%s3032_s3 + $0x28] sm:$0xff]   ;;  %s3037_s23 = smov (!%p246_p3, %s1969_s23), 3135  ;;  %vm259_vm0 = vcmask 523264  }
   0xc   : > { %900 = vmatprep.subr.bf16.mxu0 %v2351_v1  ;;  %2187 = vmatprep.subr.bf16.mxu1 %v2351_v1  ;;  %v2232_v4 = vld [vmem:[%s3032_s3 + $0x20] sm:$0xff]   ;;  %s2122_s30 = sshll.u32 %s3037_s23, 3  ;;  %v2233_v5 = vld [vmem:[%s3032_s3 + $0x18] sm:$0xff]   ;;  %v2234_v7 = vld [vmem:[%s3032_s3 + $0x10] sm:$0xff]   ;;  %v2352_v19 = vmov 0.0   ;;  %s1973_s14 = sshll.u32 %s3037_s23, 2 }
   0xd   : > { %901 = vmatpush1.bf16.msra.mxu0 %v2229_v0  ;;  %2203 = vmatpush1.bf16.msra.mxu1 %v2229_v0  ;;  %s2425_s11 = scalar_lea.vmem %s3029_s0, %s2122_s30  ;;  %v2235_v9 = vld [vmem:[%s3032_s3 + $0x8] sm:$0xff]   ;;  %v2236_v10 = vld [vmem:[%s3032_s3] sm:$0xff]   ;;  %v2237_v11 = vld [vmem:[%s3032_s3 + $0x78] sm:$0xff]   ;;  %260 = vst.msk [vmem:[#allocation2] sm:$0xff] %vm259_vm0, %v2352_v19  ;;  %s2708_s16 = scalar_lea.vmem %s3035_s6, %s1973_s14  ;;  %vm1843_vm1 = vcmask 519168  }
   0xe   : > { %902 = vmatprep.subr.bf16.mxu0 %v2351_v1  ;;  %2188 = vmatprep.subr.bf16.mxu1 %v2351_v1  ;;  %v2247_v6 = vld [vmem:[%s2425_s11 + $0x4] ss:$8 sps:$4 sm:$0xff]   ;;  %v2238_v12 = vld [vmem:[%s3032_s3 + $0x70] sm:$0xff]   ;;  %v2241_v15 = vld [vmem:[%s3032_s3 + $0x58] sm:$0xff]   ;;  %261 = vst.msk [vmem:[#allocation2 + $0x8] sm:$0xff] %vm259_vm0, %v2352_v19 }
   0xf   : > { %v2250_v8 = vld [vmem:[%s2425_s11 + $0x104] ss:$8 sps:$4 sm:$0xff]   ;;  %932 = vmatprep.mubr.bf16.mxu0 %v2247_v6  ;;  %v2242_v16 = vld [vmem:[%s3032_s3 + $0x50] sm:$0xff]   ;;  %262 = vst.msk [vmem:[#allocation2 + $0x10] sm:$0xff] %vm259_vm0, %v2352_v19  ;;  %263 = vst.msk [vmem:[#allocation2 + $0x18] sm:$0xff] %vm259_vm0, %v2352_v19 }
  0x10   : > { %1060 = vmatprep.mubr.bf16.mxu1 %v2250_v8  ;;  %v2239_v13 = vld [vmem:[%s3032_s3 + $0x68] sm:$0xff]   ;;  %v2240_v14 = vld [vmem:[%s3032_s3 + $0x60] sm:$0xff]   ;;  %264 = vst.msk [vmem:[#allocation2 + $0x20] sm:$0xff] %vm259_vm0, %v2352_v19  ;;  %265 = vst.msk [vmem:[#allocation2 + $0x28] sm:$0xff] %vm259_vm0, %v2352_v19 }
  0x11   : > { %903 = vmatpush1.bf16.msra.mxu0 %v2230_v2  ;;  %2204 = vmatpush1.bf16.msra.mxu1 %v2230_v2  ;;  %v2243_v17 = vld [vmem:[%s3032_s3 + $0x48] sm:$0xff]   ;;  %v2484_v18 = vld [vmem:[%s3032_s3 + $0x40] sm:$0xff]   ;;  %266 = vst.msk [vmem:[#allocation2 + $0x30] sm:$0xff] %vm259_vm0, %v2352_v19  ;;  %267 = vst.msk [vmem:[#allocation2 + $0x38] sm:$0xff] %vm259_vm0, %v2352_v19 }
  0x12   : > { %904 = vmatprep.subr.bf16.mxu0 %v2351_v1  ;;  %2189 = vmatprep.subr.bf16.mxu1 %v2351_v1  ;;  %268 = vst.msk [vmem:[#allocation2 + $0x40] sm:$0xff] %vm259_vm0, %v2352_v19  ;;  %269 = vst.msk [vmem:[#allocation2 + $0x48] sm:$0xff] %vm259_vm0, %v2352_v19  ;;  %v2245_v20 = vld [vmem:[%s2425_s11] ss:$8 sps:$4 sm:$0xff]   ;;  %v2251_v22 = vld [vmem:[%s2425_s11 + $0x14] ss:$8 sps:$4 sm:$0xff]  }
  0x13   : > { %270 = vst.msk [vmem:[#allocation2 + $0x50] sm:$0xff] %vm259_vm0, %v2352_v19  ;;  %271 = vst.msk [vmem:[#allocation2 + $0x58] sm:$0xff] %vm259_vm0, %v2352_v19  ;;  %v2248_v21 = vld [vmem:[%s2425_s11 + $0x100] ss:$8 sps:$4 sm:$0xff]   ;;  %v2253_v23 = vld [vmem:[%s2425_s11 + $0x114] ss:$8 sps:$4 sm:$0xff]  }
  0x14   : > { %272 = vst.msk [vmem:[#allocation2 + $0x60] sm:$0xff] %vm259_vm0, %v2352_v19  ;;  %273 = vst.msk [vmem:[#allocation2 + $0x68] sm:$0xff] %vm259_vm0, %v2352_v19  ;;  %v2255_v24 = vld [vmem:[%s2425_s11 + $0x10] ss:$8 sps:$4 sm:$0xff]   ;;  %v2257_v26 = vld [vmem:[%s2425_s11 + $0x24] ss:$8 sps:$4 sm:$0xff]  }
  0x15   : > { %905 = vmatpush1.bf16.msra.mxu0 %v2231_v3  ;;  %2205 = vmatpush1.bf16.msra.mxu1 %v2231_v3  ;;  %274 = vst.msk [vmem:[#allocation2 + $0x70] sm:$0xff] %vm259_vm0, %v2352_v19  ;;  %275 = vst.msk [vmem:[#allocation2 + $0x78] sm:$0xff] %vm259_vm0, %v2352_v19  ;;  %v2256_v25 = vld [vmem:[%s2425_s11 + $0x110] ss:$8 sps:$4 sm:$0xff]   ;;  %v2259_v27 = vld [vmem:[%s2425_s11 + $0x124] ss:$8 sps:$4 sm:$0xff]  }
  0x16   : > { %906 = vmatprep.subr.bf16.mxu0 %v2351_v1  ;;  %2190 = vmatprep.subr.bf16.mxu1 %v2351_v1  ;;  %276 = vst.msk [vmem:[#allocation2 + $0x80] sm:$0xff] %vm259_vm0, %v2352_v19  ;;  %277 = vst.msk [vmem:[#allocation2 + $0x88] sm:$0xff] %vm259_vm0, %v2352_v19  ;;  %v2261_v28 = vld [vmem:[%s2425_s11 + $0x20] ss:$8 sps:$4 sm:$0xff]   ;;  %v2263_v30 = vld [vmem:[%s2425_s11 + $0x34] ss:$8 sps:$4 sm:$0xff]  }
  0x17   : > { %278 = vst.msk [vmem:[#allocation2 + $0x90] sm:$0xff] %vm259_vm0, %v2352_v19  ;;  %279 = vst.msk [vmem:[#allocation2 + $0x98] sm:$0xff] %vm259_vm0, %v2352_v19  ;;  %v2262_v29 = vld [vmem:[%s2425_s11 + $0x120] ss:$8 sps:$4 sm:$0xff]   ;;  %v2265_v31 = vld [vmem:[%s2425_s11 + $0x134] ss:$8 sps:$4 sm:$0xff]  }
  0x18   : > { %280 = vst.msk [vmem:[#allocation2 + $0xa0] sm:$0xff] %vm259_vm0, %v2352_v19  ;;  %281 = vst.msk [vmem:[#allocation2 + $0xa8] sm:$0xff] %vm259_vm0, %v2352_v19  ;;  %v2267_v32 = vld [vmem:[%s2425_s11 + $0x30] ss:$8 sps:$4 sm:$0xff]   ;;  %v2269_v34 = vld [vmem:[%s2425_s11 + $0x44] ss:$8 sps:$4 sm:$0xff]  }
  0x19   : > { %907 = vmatpush1.bf16.msra.mxu0 %v2232_v4  ;;  %2206 = vmatpush1.bf16.msra.mxu1 %v2232_v4  ;;  %282 = vst.msk [vmem:[#allocation2 + $0xb0] sm:$0xff] %vm259_vm0, %v2352_v19  ;;  %283 = vst.msk [vmem:[#allocation2 + $0xb8] sm:$0xff] %vm259_vm0, %v2352_v19  ;;  %v2268_v33 = vld [vmem:[%s2425_s11 + $0x130] ss:$8 sps:$4 sm:$0xff]   ;;  %v2271_v35 = vld [vmem:[%s2425_s11 + $0x144] ss:$8 sps:$4 sm:$0xff]  }
  0x1a   : > { %908 = vmatprep.subr.bf16.mxu0 %v2351_v1  ;;  %2191 = vmatprep.subr.bf16.mxu1 %v2351_v1  ;;  %284 = vst.msk [vmem:[#allocation2 + $0xc0] sm:$0xff] %vm259_vm0, %v2352_v19  ;;  %285 = vst.msk [vmem:[#allocation2 + $0xc8] sm:$0xff] %vm259_vm0, %v2352_v19  ;;  %v2273_v36 = vld [vmem:[%s2425_s11 + $0x40] ss:$8 sps:$4 sm:$0xff]   ;;  %v2275_v38 = vld [vmem:[%s2425_s11 + $0x54] ss:$8 sps:$4 sm:$0xff]  }
  0x1b   : > { %286 = vst.msk [vmem:[#allocation2 + $0xd0] sm:$0xff] %vm259_vm0, %v2352_v19  ;;  %287 = vst.msk [vmem:[#allocation2 + $0xd8] sm:$0xff] %vm259_vm0, %v2352_v19  ;;  %v2274_v37 = vld [vmem:[%s2425_s11 + $0x140] ss:$8 sps:$4 sm:$0xff]   ;;  %v2277_v39 = vld [vmem:[%s2425_s11 + $0x154] ss:$8 sps:$4 sm:$0xff]  }
  0x1c   : > { %288 = vst.msk [vmem:[#allocation2 + $0xe0] sm:$0xff] %vm259_vm0, %v2352_v19  ;;  %289 = vst.msk [vmem:[#allocation2 + $0xe8] sm:$0xff] %vm259_vm0, %v2352_v19  ;;  %v2279_v40 = vld [vmem:[%s2425_s11 + $0x50] ss:$8 sps:$4 sm:$0xff]   ;;  %v2281_v42 = vld [vmem:[%s2425_s11 + $0x64] ss:$8 sps:$4 sm:$0xff]  }
  0x1d   : > { %909 = vmatpush1.bf16.msra.mxu0 %v2233_v5  ;;  %2207 = vmatpush1.bf16.msra.mxu1 %v2233_v5  ;;  %290 = vst.msk [vmem:[#allocation2 + $0xf0] sm:$0xff] %vm259_vm0, %v2352_v19  ;;  %291 = vst.msk [vmem:[#allocation2 + $0xf8] sm:$0xff] %vm259_vm0, %v2352_v19  ;;  %v2280_v41 = vld [vmem:[%s2425_s11 + $0x150] ss:$8 sps:$4 sm:$0xff]   ;;  %v2283_v43 = vld [vmem:[%s2425_s11 + $0x164] ss:$8 sps:$4 sm:$0xff]  }
  0x1e   : > { %910 = vmatprep.subr.bf16.mxu0 %v2351_v1  ;;  %2192 = vmatprep.subr.bf16.mxu1 %v2351_v1  ;;  %292 = vst.msk [vmem:[#allocation2 + $0x100] sm:$0xff] %vm259_vm0, %v2352_v19  ;;  %293 = vst.msk [vmem:[#allocation2 + $0x108] sm:$0xff] %vm259_vm0, %v2352_v19  ;;  %v2285_v44 = vld [vmem:[%s2425_s11 + $0x60] ss:$8 sps:$4 sm:$0xff]   ;;  %v2287_v46 = vld [vmem:[%s2425_s11 + $0x74] ss:$8 sps:$4 sm:$0xff]  }
  0x1f   : > { %294 = vst.msk [vmem:[#allocation2 + $0x110] sm:$0xff] %vm259_vm0, %v2352_v19  ;;  %295 = vst.msk [vmem:[#allocation2 + $0x118] sm:$0xff] %vm259_vm0, %v2352_v19  ;;  %v2286_v45 = vld [vmem:[%s2425_s11 + $0x160] ss:$8 sps:$4 sm:$0xff]   ;;  %v2289_v47 = vld [vmem:[%s2425_s11 + $0x174] ss:$8 sps:$4 sm:$0xff]  }
  0x20   : > { %296 = vst.msk [vmem:[#allocation2 + $0x120] sm:$0xff] %vm259_vm0, %v2352_v19  ;;  %297 = vst.msk [vmem:[#allocation2 + $0x128] sm:$0xff] %vm259_vm0, %v2352_v19  ;;  %v2291_v48 = vld [vmem:[%s2425_s11 + $0x70] ss:$8 sps:$4 sm:$0xff]   ;;  %v2293_v50 = vld [vmem:[%s2425_s11 + $0x84] ss:$8 sps:$4 sm:$0xff]  }
  0x21   : > { %911 = vmatpush1.bf16.msra.mxu0 %v2234_v7  ;;  %2208 = vmatpush1.bf16.msra.mxu1 %v2234_v7  ;;  %298 = vst.msk [vmem:[#allocation2 + $0x130] sm:$0xff] %vm259_vm0, %v2352_v19  ;;  %299 = vst.msk [vmem:[#allocation2 + $0x138] sm:$0xff] %vm259_vm0, %v2352_v19  ;;  %v2292_v49 = vld [vmem:[%s2425_s11 + $0x170] ss:$8 sps:$4 sm:$0xff]   ;;  %v2295_v51 = vld [vmem:[%s2425_s11 + $0x184] ss:$8 sps:$4 sm:$0xff]  }
  0x22   : > { %912 = vmatprep.subr.bf16.mxu0 %v2351_v1  ;;  %2193 = vmatprep.subr.bf16.mxu1 %v2351_v1  ;;  %300 = vst.msk [vmem:[#allocation2 + $0x140] sm:$0xff] %vm259_vm0, %v2352_v19  ;;  %301 = vst.msk [vmem:[#allocation2 + $0x148] sm:$0xff] %vm259_vm0, %v2352_v19  ;;  %v2297_v52 = vld [vmem:[%s2425_s11 + $0x80] ss:$8 sps:$4 sm:$0xff]   ;;  %v2299_v54 = vld [vmem:[%s2425_s11 + $0x94] ss:$8 sps:$4 sm:$0xff]  }
  0x23   : > { %302 = vst.msk [vmem:[#allocation2 + $0x150] sm:$0xff] %vm259_vm0, %v2352_v19  ;;  %303 = vst.msk [vmem:[#allocation2 + $0x158] sm:$0xff] %vm259_vm0, %v2352_v19  ;;  %v2298_v53 = vld [vmem:[%s2425_s11 + $0x180] ss:$8 sps:$4 sm:$0xff]   ;;  %v2301_v55 = vld [vmem:[%s2425_s11 + $0x194] ss:$8 sps:$4 sm:$0xff]  }
  0x24   : > { %304 = vst.msk [vmem:[#allocation2 + $0x160] sm:$0xff] %vm259_vm0, %v2352_v19  ;;  %305 = vst.msk [vmem:[#allocation2 + $0x168] sm:$0xff] %vm259_vm0, %v2352_v19  ;;  %v2303_v56 = vld [vmem:[%s2425_s11 + $0x90] ss:$8 sps:$4 sm:$0xff]   ;;  %v2305_v58 = vld [vmem:[%s2425_s11 + $0xa4] ss:$8 sps:$4 sm:$0xff]  }
  0x25   : > { %913 = vmatpush1.bf16.msra.mxu0 %v2235_v9  ;;  %2209 = vmatpush1.bf16.msra.mxu1 %v2235_v9  ;;  %306 = vst.msk [vmem:[#allocation2 + $0x170] sm:$0xff] %vm259_vm0, %v2352_v19  ;;  %307 = vst.msk [vmem:[#allocation2 + $0x178] sm:$0xff] %vm259_vm0, %v2352_v19  ;;  %v2304_v57 = vld [vmem:[%s2425_s11 + $0x190] ss:$8 sps:$4 sm:$0xff]   ;;  %v2307_v59 = vld [vmem:[%s2425_s11 + $0x1a4] ss:$8 sps:$4 sm:$0xff]  }
  0x26   : > { %914 = vmatprep.subr.bf16.mxu0 %v2351_v1  ;;  %2194 = vmatprep.subr.bf16.mxu1 %v2351_v1  ;;  %308 = vst.msk [vmem:[#allocation2 + $0x180] sm:$0xff] %vm259_vm0, %v2352_v19  ;;  %309 = vst.msk [vmem:[#allocation2 + $0x188] sm:$0xff] %vm259_vm0, %v2352_v19  ;;  %v2309_v60 = vld [vmem:[%s2425_s11 + $0xa0] ss:$8 sps:$4 sm:$0xff]   ;;  %v2311_v62 = vld [vmem:[%s2425_s11 + $0xb4] ss:$8 sps:$4 sm:$0xff]  }
  0x27   : > { %310 = vst.msk [vmem:[#allocation2 + $0x190] sm:$0xff] %vm259_vm0, %v2352_v19  ;;  %311 = vst.msk [vmem:[#allocation2 + $0x198] sm:$0xff] %vm259_vm0, %v2352_v19  ;;  %v2310_v61 = vld [vmem:[%s2425_s11 + $0x1a0] ss:$8 sps:$4 sm:$0xff]   ;;  %v2313_v63 = vld [vmem:[%s2425_s11 + $0x1b4] ss:$8 sps:$4 sm:$0xff]  }
  0x28   : > { %312 = vst.msk [vmem:[#allocation2 + $0x1a0] sm:$0xff] %vm259_vm0, %v2352_v19  ;;  %313 = vst.msk [vmem:[#allocation2 + $0x1a8] sm:$0xff] %vm259_vm0, %v2352_v19  ;;  %v2315_v0 = vld [vmem:[%s2425_s11 + $0xb0] ss:$8 sps:$4 sm:$0xff]   ;;  %v2317_v2 = vld [vmem:[%s2425_s11 + $0xc4] ss:$8 sps:$4 sm:$0xff]  }
  0x29   : > { %915 = vmatpush1.bf16.msra.mxu0 %v2236_v10  ;;  %2210 = vmatpush1.bf16.msra.mxu1 %v2236_v10  ;;  %314 = vst.msk [vmem:[#allocation2 + $0x1b0] sm:$0xff] %vm259_vm0, %v2352_v19  ;;  %315 = vst.msk [vmem:[#allocation2 + $0x1b8] sm:$0xff] %vm259_vm0, %v2352_v19  ;;  %v2319_v3 = vld [vmem:[%s2425_s11 + $0x1c4] ss:$8 sps:$4 sm:$0xff]   ;;  %v2321_v4 = vld [vmem:[%s2425_s11 + $0xc0] ss:$8 sps:$4 sm:$0xff]  }
  0x2a   : > { %916 = vmatprep.subr.bf16.mxu0 %v2351_v1  ;;  %2195 = vmatprep.subr.bf16.mxu1 %v2351_v1  ;;  %316 = vst.msk [vmem:[#allocation2 + $0x1c0] sm:$0xff] %vm259_vm0, %v2352_v19  ;;  %317 = vst.msk [vmem:[#allocation2 + $0x1c8] sm:$0xff] %vm259_vm0, %v2352_v19  ;;  %v2322_v5 = vld [vmem:[%s2425_s11 + $0x1c0] ss:$8 sps:$4 sm:$0xff]   ;;  %v2323_v6 = vld [vmem:[%s2425_s11 + $0xd4] ss:$8 sps:$4 sm:$0xff]  }
  0x2b   : > { %318 = vst.msk [vmem:[#allocation2 + $0x1d0] sm:$0xff] %vm259_vm0, %v2352_v19  ;;  %319 = vst.msk [vmem:[#allocation2 + $0x1d8] sm:$0xff] %vm259_vm0, %v2352_v19  ;;  %v2325_v7 = vld [vmem:[%s2425_s11 + $0x1d4] ss:$8 sps:$4 sm:$0xff]   ;;  %v2327_v8 = vld [vmem:[%s2425_s11 + $0xd0] ss:$8 sps:$4 sm:$0xff]  }
  0x2c   : > { %320 = vst.msk [vmem:[#allocation2 + $0x1e0] sm:$0xff] %vm259_vm0, %v2352_v19  ;;  %321 = vst.msk [vmem:[#allocation2 + $0x1e8] sm:$0xff] %vm259_vm0, %v2352_v19  ;;  %v2328_v9 = vld [vmem:[%s2425_s11 + $0x1d0] ss:$8 sps:$4 sm:$0xff]   ;;  %v2329_v10 = vld [vmem:[%s2425_s11 + $0xe4] ss:$8 sps:$4 sm:$0xff]  }
  0x2d   : > { %917 = vmatpush2.bf16.msra.mxu0 %v2237_v11  ;;  %2211 = vmatpush2.bf16.msra.mxu1 %v2237_v11  ;;  %322 = vst.msk [vmem:[#allocation2 + $0x1f0] sm:$0xff] %vm259_vm0, %v2352_v19  ;;  %323 = vst.msk [vmem:[#allocation2 + $0x1f8] sm:$0xff] %vm259_vm0, %v2352_v19  ;;  %v2331_v11 = vld [vmem:[%s2425_s11 + $0x1e4] ss:$8 sps:$4 sm:$0xff]  }
  0x2e   : > { %918 = vmatprep.subr.bf16.mxu0 %v2351_v1  ;;  %2196 = vmatprep.subr.bf16.mxu1 %v2351_v1  ;;  %v420_v19 = vld [vmem:[#allocation2 + $0x100] sm:$0xff] }
  0x31   : > { %919 = vmatpush2.bf16.msra.mxu0 %v2238_v12  ;;  %2212 = vmatpush2.bf16.msra.mxu1 %v2238_v12  ;;  %v2333_v12 = vld [vmem:[%s2425_s11 + $0xe0] ss:$8 sps:$4 sm:$0xff]  }
  0x32   : > { %920 = vmatprep.subr.bf16.mxu0 %v2351_v1  ;;  %2197 = vmatprep.subr.bf16.mxu1 %v2351_v1 }
  0x35   : > { %921 = vmatpush2.bf16.msra.mxu0 %v2239_v13  ;;  %2213 = vmatpush2.bf16.msra.mxu1 %v2239_v13  ;;  %v2334_v13 = vld [vmem:[%s2425_s11 + $0x1e0] ss:$8 sps:$4 sm:$0xff]  }
  0x36   : > { %922 = vmatprep.subr.bf16.mxu0 %v2351_v1  ;;  %2198 = vmatprep.subr.bf16.mxu1 %v2351_v1 }
  0x39   : > { %923 = vmatpush2.bf16.msra.mxu0 %v2240_v14  ;;  %2214 = vmatpush2.bf16.msra.mxu1 %v2240_v14  ;;  %v2335_v14 = vld [vmem:[%s2425_s11 + $0xf4] ss:$8 sps:$4 sm:$0xff]  }
  0x3a   : > { %924 = vmatprep.subr.bf16.mxu0 %v2351_v1  ;;  %2199 = vmatprep.subr.bf16.mxu1 %v2351_v1 }
  0x3d   : > { %925 = vmatpush2.bf16.msra.mxu0 %v2241_v15  ;;  %2215 = vmatpush2.bf16.msra.mxu1 %v2241_v15  ;;  %v2337_v15 = vld [vmem:[%s2425_s11 + $0x1f4] ss:$8 sps:$4 sm:$0xff]  }
  0x3e   : > { %926 = vmatprep.subr.bf16.mxu0 %v2351_v1  ;;  %2200 = vmatprep.subr.bf16.mxu1 %v2351_v1 }
  0x41   : > { %927 = vmatpush2.bf16.msra.mxu0 %v2242_v16  ;;  %2216 = vmatpush2.bf16.msra.mxu1 %v2242_v16  ;;  %v2339_v16 = vld [vmem:[%s2425_s11 + $0xf0] ss:$8 sps:$4 sm:$0xff]  }
  0x42   : > { %928 = vmatprep.subr.bf16.mxu0 %v2351_v1  ;;  %2201 = vmatprep.subr.bf16.mxu1 %v2351_v1 }
  0x45   : > { %929 = vmatpush2.bf16.msra.mxu0 %v2243_v17  ;;  %2217 = vmatpush2.bf16.msra.mxu1 %v2243_v17  ;;  %v2340_v17 = vld [vmem:[%s2425_s11 + $0x1f0] ss:$8 sps:$4 sm:$0xff]  }
  0x46   : > { %930 = vmatprep.subr.bf16.mxu0 %v2351_v1  ;;  %2202 = vmatprep.subr.bf16.mxu1 %v2351_v1  ;;  %v2316_v1 = vld [vmem:[%s2425_s11 + $0x1b0] ss:$8 sps:$4 sm:$0xff]  }
  0x49   : > { %931 = vmatpush2.bf16.msra.mxu0 %v2484_v18  ;;  %2218 = vmatpush2.bf16.msra.mxu1 %v2484_v18  ;;  %v388_v18 = vld [vmem:[#allocation2] sm:$0xff] }
  0x4c   : > { %933 = vmatmul.mubr.bf16.vlgmr.msra.gmra.mxu0 %v2245_v20  ;;  %1061 = vmatmul.mubr.bf16.vlgmr.msra.gmra.mxu1 %v2248_v21 }
  0x4d   : > { %940 = vmatprep.mubr.bf16.mxu0 %v2251_v22  ;;  %1068 = vmatprep.mubr.bf16.mxu1 %v2253_v23 }
  0x54   : > { %941 = vmatmul.mubr.bf16.gmra.mxu0 %v2255_v24  ;;  %1069 = vmatmul.mubr.bf16.gmra.mxu1 %v2256_v25 }
  0x55   : > { %948 = vmatprep.mubr.bf16.mxu0 %v2257_v26  ;;  %1076 = vmatprep.mubr.bf16.mxu1 %v2259_v27  ;;  %v389_v26 = vld [vmem:[#allocation2 + $0x8] sm:$0xff] }
  0x56   : > { %v421_v27 = vld [vmem:[#allocation2 + $0x108] sm:$0xff] }
  0x5c   : > { %949 = vmatmul.mubr.bf16.gmra.mxu0 %v2261_v28  ;;  %1077 = vmatmul.mubr.bf16.gmra.mxu1 %v2262_v29 }
  0x5d   : > { %956 = vmatprep.mubr.bf16.mxu0 %v2263_v30  ;;  %1084 = vmatprep.mubr.bf16.mxu1 %v2265_v31 }
  0x64   : > { %957 = vmatmul.mubr.bf16.gmra.mxu0 %v2267_v32  ;;  %1085 = vmatmul.mubr.bf16.gmra.mxu1 %v2268_v33 }
  0x65   : > { %964 = vmatprep.mubr.bf16.mxu0 %v2269_v34  ;;  %1092 = vmatprep.mubr.bf16.mxu1 %v2271_v35  ;;  %v390_v34 = vld [vmem:[#allocation2 + $0x10] sm:$0xff] }
  0x66   : > { %v422_v35 = vld [vmem:[#allocation2 + $0x110] sm:$0xff] }
  0x6c   : > { %965 = vmatmul.mubr.bf16.gmra.mxu0 %v2273_v36  ;;  %1093 = vmatmul.mubr.bf16.gmra.mxu1 %v2274_v37  ;;  %v2687_v36 = vld [vmem:[%s3033_s4] ss:$0 sm:$0xff] }
  0x6d   : > { %972 = vmatprep.mubr.bf16.mxu0 %v2275_v38  ;;  %1100 = vmatprep.mubr.bf16.mxu1 %v2277_v39  ;;  %v2692_v39 = vld [vmem:[%s3034_s5] ss:$0 sm:$0xff] }
  0x74   : > { %973 = vmatmul.mubr.bf16.gmra.mxu0 %v2279_v40  ;;  %1101 = vmatmul.mubr.bf16.gmra.mxu1 %v2280_v41 }
  0x75   : > { %980 = vmatprep.mubr.bf16.mxu0 %v2281_v42  ;;  %1108 = vmatprep.mubr.bf16.mxu1 %v2283_v43  ;;  %v391_v42 = vld [vmem:[#allocation2 + $0x18] sm:$0xff] }
  0x7c   : > { %981 = vmatmul.mubr.bf16.gmra.mxu0 %v2285_v44  ;;  %1109 = vmatmul.mubr.bf16.gmra.mxu1 %v2286_v45 }
  0x7d   : > { %988 = vmatprep.mubr.bf16.mxu0 %v2287_v46  ;;  %1116 = vmatprep.mubr.bf16.mxu1 %v2289_v47  ;;  %v423_v47 = vld [vmem:[#allocation2 + $0x118] sm:$0xff] }
  0x84   : > { %989 = vmatmul.mubr.bf16.gmra.mxu0 %v2291_v48  ;;  %1117 = vmatmul.mubr.bf16.gmra.mxu1 %v2292_v49 }
  0x85   : > { %996 = vmatprep.mubr.bf16.mxu0 %v2293_v50  ;;  %1124 = vmatprep.mubr.bf16.mxu1 %v2295_v51 }
  0x8c   : > { %997 = vmatmul.mubr.bf16.gmra.mxu0 %v2297_v52  ;;  %1125 = vmatmul.mubr.bf16.gmra.mxu1 %v2298_v53 }
  0x8d   : > { %1004 = vmatprep.mubr.bf16.mxu0 %v2299_v54  ;;  %1132 = vmatprep.mubr.bf16.mxu1 %v2301_v55 }
  0x94   : > { %1005 = vmatmul.mubr.bf16.gmra.mxu0 %v2303_v56  ;;  %1133 = vmatmul.mubr.bf16.gmra.mxu1 %v2304_v57 }
  0x95   : > { %1012 = vmatprep.mubr.bf16.mxu0 %v2305_v58  ;;  %1140 = vmatprep.mubr.bf16.mxu1 %v2307_v59 }
  0x9c   : > { %1013 = vmatmul.mubr.bf16.gmra.mxu0 %v2309_v60  ;;  %1141 = vmatmul.mubr.bf16.gmra.mxu1 %v2310_v61 }
  0x9d   : > { %1020 = vmatprep.mubr.bf16.mxu0 %v2311_v62  ;;  %1148 = vmatprep.mubr.bf16.mxu1 %v2313_v63 }
  0xa4   : > { %1021 = vmatmul.mubr.bf16.gmra.mxu0 %v2315_v0  ;;  %1149 = vmatmul.mubr.bf16.gmra.mxu1 %v2316_v1  ;;  %v392_v0 = vld [vmem:[#allocation2 + $0x20] sm:$0xff] }
  0xa5   : > { %1028 = vmatprep.mubr.bf16.mxu0 %v2317_v2  ;;  %1156 = vmatprep.mubr.bf16.mxu1 %v2319_v3  ;;  %v424_v1 = vld [vmem:[#allocation2 + $0x120] sm:$0xff] }
  0xac   : > { %1029 = vmatmul.mubr.bf16.gmra.mxu0 %v2321_v4  ;;  %1157 = vmatmul.mubr.bf16.gmra.mxu1 %v2322_v5 }
  0xad   : > { %1036 = vmatprep.mubr.bf16.mxu0 %v2323_v6  ;;  %1164 = vmatprep.mubr.bf16.mxu1 %v2325_v7 }
  0xb4   : > { %1037 = vmatmul.mubr.bf16.gmra.mxu0 %v2327_v8  ;;  %1165 = vmatmul.mubr.bf16.gmra.mxu1 %v2328_v9 }
  0xb5   : > { %1044 = vmatprep.mubr.bf16.mxu0 %v2329_v10  ;;  %1172 = vmatprep.mubr.bf16.mxu1 %v2331_v11 }
  0xbc   : > { %1045 = vmatmul.mubr.bf16.gmra.mxu0 %v2333_v12  ;;  %1173 = vmatmul.mubr.bf16.gmra.mxu1 %v2334_v13 }
  0xbd   : > { %1052 = vmatprep.mubr.bf16.mxu0 %v2335_v14  ;;  %1180 = vmatprep.mubr.bf16.mxu1 %v2337_v15 }
  0xc4   : > { %1053 = vmatmul.mubr.bf16.gmra.mxu0 %v2339_v16  ;;  %1181 = vmatmul.mubr.bf16.gmra.mxu1 %v2340_v17 }
 0x10c   : > { %v934_v20 = vpop.f32.mrf.mxu0  ;;  %v1062_v21 = vpop.f32.mrf.mxu1 }
 0x10d   : > { %v1189_v22 = vadd.f32 %v934_v20, %v388_v18  ;;  %v1221_v23 = vadd.f32 %v1062_v21, %v420_v19  ;;  %v393_v18 = vld [vmem:[#allocation2 + $0x28] sm:$0xff] }
 0x10e   : > { %v936_v24 = vpop.f32.mrf.mxu0  ;;  %v1064_v25 = vpop.f32.mrf.mxu1  ;;  %v425_v19 = vld [vmem:[#allocation2 + $0x128] sm:$0xff] }
 0x10f   : > { %1253 = vst.msk [vmem:[#allocation2] sm:$0xff] %vm259_vm0, %v1189_v22  ;;  %1285 = vst.msk [vmem:[#allocation2 + $0x100] sm:$0xff] %vm259_vm0, %v1221_v23 }
 0x110   : > { %v937_v28 = vpop.f32.mrf.mxu0  ;;  %v1065_v29 = vpop.f32.mrf.mxu1 }
 0x111   : > { %v1190_v30 = vadd.f32 %v937_v28, %v389_v26  ;;  %v1222_v31 = vadd.f32 %v1065_v29, %v421_v27 }
 0x112   : > { %v939_v32 = vpop.f32.mrf.mxu0  ;;  %v1067_v33 = vpop.f32.mrf.mxu1 }
 0x113   : > { %1254 = vst.msk [vmem:[#allocation2 + $0x8] sm:$0xff] %vm259_vm0, %v1190_v30  ;;  %1286 = vst.msk [vmem:[#allocation2 + $0x108] sm:$0xff] %vm259_vm0, %v1222_v31 }
 0x114   : > { %v942_v37 = vpop.f32.mrf.mxu0  ;;  %v1070_v38 = vpop.f32.mrf.mxu1 }
 0x115   : > { %v1191_v40 = vadd.f32 %v942_v37, %v390_v34  ;;  %v1223_v41 = vadd.f32 %v1070_v38, %v422_v35  ;;  %v394_v37 = vld [vmem:[#allocation2 + $0x30] sm:$0xff] }
 0x116   : > { %v1317_v43 = vld [vmem:[#allocation2] sm:$0xff]  ;;  %v944_v45 = vpop.f32.mrf.mxu0  ;;  %v1072_v46 = vpop.f32.mrf.mxu1  ;;  %v426_v38 = vld [vmem:[#allocation2 + $0x130] sm:$0xff] }
 0x117   : > { %v1349_v44 = vld [vmem:[#allocation2 + $0x100] sm:$0xff]  ;;  %v1388_v48 = vmul.f32 %v2687_v36, %v1317_v43  ;;  %1255 = vst.msk [vmem:[#allocation2 + $0x10] sm:$0xff] %vm259_vm0, %v1191_v40  ;;  %1287 = vst.msk [vmem:[#allocation2 + $0x110] sm:$0xff] %vm259_vm0, %v1223_v41 }
 0x118   : > { %v1420_v49 = vmul.f32 %v2687_v36, %v1349_v44  ;;  %v945_v50 = vpop.f32.mrf.mxu0  ;;  %v1073_v51 = vpop.f32.mrf.mxu1 }
 0x119   : > { %v1459_v52 = vadd.f32 %v2692_v39, %v1388_v48  ;;  %v1192_v54 = vadd.f32 %v945_v50, %v391_v42  ;;  %v1224_v55 = vadd.f32 %v1073_v51, %v423_v47  ;;  %v395_v50 = vld [vmem:[#allocation2 + $0x38] sm:$0xff] }
 0x11a   : > { %v1491_v53 = vadd.f32 %v2692_v39, %v1420_v49  ;;  %v1318_v56 = vld [vmem:[#allocation2 + $0x8] sm:$0xff]  ;;  %v947_v58 = vpop.f32.mrf.mxu0  ;;  %v1075_v59 = vpop.f32.mrf.mxu1  ;;  %v427_v51 = vld [vmem:[#allocation2 + $0x138] sm:$0xff] }
 0x11b   : > { %v1350_v57 = vld [vmem:[#allocation2 + $0x108] sm:$0xff]  ;;  %v1523_v60 = vmax.f32 %v1459_v52, 0.0  ;;  %v1389_v62 = vmul.f32 %v2687_v36, %v1318_v56  ;;  %1256 = vst.msk [vmem:[#allocation2 + $0x18] sm:$0xff] %vm259_vm0, %v1192_v54  ;;  %1288 = vst.msk [vmem:[#allocation2 + $0x118] sm:$0xff] %vm259_vm0, %v1224_v55 }
 0x11c   : > { %v1555_v61 = vmax.f32 %v1491_v53, 0.0  ;;  %v1421_v63 = vmul.f32 %v2687_v36, %v1350_v57  ;;  %v950_v2 = vpop.f32.mrf.mxu0  ;;  %v1078_v3 = vpop.f32.mrf.mxu1 }
 0x11d   : > { %v2123_v4 = vpack.c.bf16 %v1523_v60, %v1523_v60  ;;  %v1460_v6 = vadd.f32 %v2692_v39, %v1389_v62  ;;  %v1193_v10 = vadd.f32 %v950_v2, %v392_v0  ;;  %v1225_v11 = vadd.f32 %v1078_v3, %v424_v1 }
 0x11e   : > { %v2155_v5 = vpack.c.bf16 %v1555_v61, %v1555_v61  ;;  %v1492_v7 = vadd.f32 %v2692_v39, %v1421_v63  ;;  %v1319_v8 = vld [vmem:[#allocation2 + $0x10] sm:$0xff]  ;;  %v952_v12 = vpop.f32.mrf.mxu0  ;;  %v1080_v13 = vpop.f32.mrf.mxu1 }
 0x11f   : > { %v1351_v9 = vld [vmem:[#allocation2 + $0x110] sm:$0xff]  ;;  %1844 = vst.msk [vmem:[%s2708_s16] sm:$0xf] %vm1843_vm1, %v2123_v4  ;;  %v1524_v14 = vmax.f32 %v1460_v6, 0.0  ;;  %v1390_v16 = vmul.f32 %v2687_v36, %v1319_v8  ;;  %v396_v4 = vld [vmem:[#allocation2 + $0x40] sm:$0xff] }
 0x120   : > { %1876 = vst.msk [vmem:[%s2708_s16 + $0x80] sm:$0xf] %vm1843_vm1, %v2155_v5  ;;  %v1556_v15 = vmax.f32 %v1492_v7, 0.0  ;;  %v1422_v17 = vmul.f32 %v2687_v36, %v1351_v9  ;;  %v953_v20 = vpop.f32.mrf.mxu0  ;;  %v1081_v21 = vpop.f32.mrf.mxu1  ;;  %v428_v5 = vld [vmem:[#allocation2 + $0x140] sm:$0xff] }
 0x121   : > { %1257 = vst.msk [vmem:[#allocation2 + $0x20] sm:$0xff] %vm259_vm0, %v1193_v10  ;;  %1289 = vst.msk [vmem:[#allocation2 + $0x120] sm:$0xff] %vm259_vm0, %v1225_v11  ;;  %v2124_v22 = vpack.c.bf16 %v1524_v14, %v1524_v14  ;;  %v1461_v24 = vadd.f32 %v2692_v39, %v1390_v16  ;;  %v1194_v28 = vadd.f32 %v953_v20, %v393_v18 }
 0x122   : > { %v2156_v23 = vpack.c.bf16 %v1556_v15, %v1556_v15  ;;  %v1493_v25 = vadd.f32 %v2692_v39, %v1422_v17  ;;  %v1320_v26 = vld [vmem:[#allocation2 + $0x18] sm:$0xff]  ;;  %v1226_v29 = vadd.f32 %v1081_v21, %v425_v19  ;;  %v955_v30 = vpop.f32.mrf.mxu0  ;;  %v1083_v31 = vpop.f32.mrf.mxu1 }
 0x123   : > { %v1352_v27 = vld [vmem:[#allocation2 + $0x118] sm:$0xff]  ;;  %1845 = vst.msk [vmem:[%s2708_s16 + $0x4] sm:$0xf] %vm1843_vm1, %v2124_v22  ;;  %v1525_v32 = vmax.f32 %v1461_v24, 0.0  ;;  %v1391_v34 = vmul.f32 %v2687_v36, %v1320_v26  ;;  %v397_v22 = vld [vmem:[#allocation2 + $0x48] sm:$0xff] }
 0x124   : > { %1877 = vst.msk [vmem:[%s2708_s16 + $0x84] sm:$0xf] %vm1843_vm1, %v2156_v23  ;;  %v1557_v33 = vmax.f32 %v1493_v25, 0.0  ;;  %v1423_v35 = vmul.f32 %v2687_v36, %v1352_v27  ;;  %v958_v40 = vpop.f32.mrf.mxu0  ;;  %v1086_v41 = vpop.f32.mrf.mxu1  ;;  %v429_v23 = vld [vmem:[#allocation2 + $0x148] sm:$0xff] }
 0x125   : > { %1258 = vst.msk [vmem:[#allocation2 + $0x28] sm:$0xff] %vm259_vm0, %v1194_v28  ;;  %1290 = vst.msk [vmem:[#allocation2 + $0x128] sm:$0xff] %vm259_vm0, %v1226_v29  ;;  %v2125_v42 = vpack.c.bf16 %v1525_v32, %v1525_v32  ;;  %v1462_v44 = vadd.f32 %v2692_v39, %v1391_v34  ;;  %v1195_v46 = vadd.f32 %v958_v40, %v394_v37  ;;  %v398_v34 = vld [vmem:[#allocation2 + $0x50] sm:$0xff] }
 0x126   : > { %v2157_v43 = vpack.c.bf16 %v1557_v33, %v1557_v33  ;;  %v1494_v45 = vadd.f32 %v2692_v39, %v1423_v35  ;;  %v1227_v47 = vadd.f32 %v1086_v41, %v426_v38  ;;  %v960_v48 = vpop.f32.mrf.mxu0  ;;  %v1088_v49 = vpop.f32.mrf.mxu1 }
 0x127   : > { %1846 = vst.msk [vmem:[%s2708_s16 + $0x8] sm:$0xf] %vm1843_vm1, %v2125_v42  ;;  %v1526_v52 = vmax.f32 %v1462_v44, 0.0 }
 0x128   : > { %1878 = vst.msk [vmem:[%s2708_s16 + $0x88] sm:$0xf] %vm1843_vm1, %v2157_v43  ;;  %v1558_v53 = vmax.f32 %v1494_v45, 0.0  ;;  %v1321_v54 = vld [vmem:[#allocation2 + $0x20] sm:$0xff]  ;;  %v961_v58 = vpop.f32.mrf.mxu0  ;;  %v1089_v59 = vpop.f32.mrf.mxu1  ;;  %v430_v45 = vld [vmem:[#allocation2 + $0x150] sm:$0xff] }
 0x129   : > { %v1353_v55 = vld [vmem:[#allocation2 + $0x120] sm:$0xff]  ;;  %v1392_v56 = vmul.f32 %v2687_v36, %v1321_v54  ;;  %1259 = vst.msk [vmem:[#allocation2 + $0x30] sm:$0xff] %vm259_vm0, %v1195_v46  ;;  %1291 = vst.msk [vmem:[#allocation2 + $0x130] sm:$0xff] %vm259_vm0, %v1227_v47  ;;  %v2126_v60 = vpack.c.bf16 %v1526_v52, %v1526_v52  ;;  %v1196_v62 = vadd.f32 %v961_v58, %v395_v50 }
 0x12a   : > { %v1424_v57 = vmul.f32 %v2687_v36, %v1353_v55  ;;  %v2158_v61 = vpack.c.bf16 %v1558_v53, %v1558_v53  ;;  %v1228_v63 = vadd.f32 %v1089_v59, %v427_v51  ;;  %v963_v2 = vpop.f32.mrf.mxu0  ;;  %v1091_v3 = vpop.f32.mrf.mxu1 }
 0x12b   : > { %v1463_v0 = vadd.f32 %v2692_v39, %v1392_v56  ;;  %1847 = vst.msk [vmem:[%s2708_s16 + $0xc] sm:$0xf] %vm1843_vm1, %v2126_v60  ;;  %v399_v2 = vld [vmem:[#allocation2 + $0x58] sm:$0xff] }
 0x12c   : > { %v1495_v1 = vadd.f32 %v2692_v39, %v1424_v57  ;;  %1879 = vst.msk [vmem:[%s2708_s16 + $0x8c] sm:$0xf] %vm1843_vm1, %v2158_v61  ;;  %v1322_v6 = vld [vmem:[#allocation2 + $0x28] sm:$0xff]  ;;  %v966_v12 = vpop.f32.mrf.mxu0  ;;  %v1094_v13 = vpop.f32.mrf.mxu1  ;;  %v431_v3 = vld [vmem:[#allocation2 + $0x158] sm:$0xff] }
 0x12d   : > { %v1354_v7 = vld [vmem:[#allocation2 + $0x128] sm:$0xff]  ;;  %1260 = vst.msk [vmem:[#allocation2 + $0x38] sm:$0xff] %vm259_vm0, %v1196_v62  ;;  %1292 = vst.msk [vmem:[#allocation2 + $0x138] sm:$0xff] %vm259_vm0, %v1228_v63  ;;  %v1527_v8 = vmax.f32 %v1463_v0, 0.0  ;;  %v1393_v10 = vmul.f32 %v2687_v36, %v1322_v6  ;;  %v1197_v14 = vadd.f32 %v966_v12, %v396_v4  ;;  %v1229_v15 = vadd.f32 %v1094_v13, %v428_v5 }
 0x12e   : > { %v1559_v9 = vmax.f32 %v1495_v1, 0.0  ;;  %v1425_v11 = vmul.f32 %v2687_v36, %v1354_v7  ;;  %v968_v20 = vpop.f32.mrf.mxu0  ;;  %v1096_v21 = vpop.f32.mrf.mxu1 }
 0x12f   : > { %v2127_v16 = vpack.c.bf16 %v1527_v8, %v1527_v8  ;;  %v1464_v18 = vadd.f32 %v2692_v39, %v1393_v10  ;;  %1261 = vst.msk [vmem:[#allocation2 + $0x40] sm:$0xff] %vm259_vm0, %v1197_v14  ;;  %1293 = vst.msk [vmem:[#allocation2 + $0x140] sm:$0xff] %vm259_vm0, %v1229_v15  ;;  %v400_v20 = vld [vmem:[#allocation2 + $0x60] sm:$0xff] }
 0x130   : > { %v2159_v17 = vpack.c.bf16 %v1559_v9, %v1559_v9  ;;  %v1496_v19 = vadd.f32 %v2692_v39, %v1425_v11  ;;  %v1323_v24 = vld [vmem:[#allocation2 + $0x30] sm:$0xff]  ;;  %v969_v30 = vpop.f32.mrf.mxu0  ;;  %v1097_v31 = vpop.f32.mrf.mxu1  ;;  %v432_v21 = vld [vmem:[#allocation2 + $0x160] sm:$0xff] }
 0x131   : > { %v1355_v25 = vld [vmem:[#allocation2 + $0x130] sm:$0xff]  ;;  %1848 = vst.msk [vmem:[%s2708_s16 + $0x10] sm:$0xf] %vm1843_vm1, %v2127_v16  ;;  %v1528_v26 = vmax.f32 %v1464_v18, 0.0  ;;  %v1394_v28 = vmul.f32 %v2687_v36, %v1323_v24  ;;  %v1198_v32 = vadd.f32 %v969_v30, %v397_v22  ;;  %v1230_v33 = vadd.f32 %v1097_v31, %v429_v23 }
 0x132   : > { %1880 = vst.msk [vmem:[%s2708_s16 + $0x90] sm:$0xf] %vm1843_vm1, %v2159_v17  ;;  %v1560_v27 = vmax.f32 %v1496_v19, 0.0  ;;  %v1426_v29 = vmul.f32 %v2687_v36, %v1355_v25  ;;  %v971_v43 = vpop.f32.mrf.mxu0  ;;  %v1099_v44 = vpop.f32.mrf.mxu1 }
 0x133   : > { %v2128_v35 = vpack.c.bf16 %v1528_v26, %v1528_v26  ;;  %v1465_v38 = vadd.f32 %v2692_v39, %v1394_v28  ;;  %1262 = vst.msk [vmem:[#allocation2 + $0x48] sm:$0xff] %vm259_vm0, %v1198_v32  ;;  %1294 = vst.msk [vmem:[#allocation2 + $0x148] sm:$0xff] %vm259_vm0, %v1230_v33 }
 0x134   : > { %v2160_v37 = vpack.c.bf16 %v1560_v27, %v1560_v27  ;;  %v1497_v40 = vadd.f32 %v2692_v39, %v1426_v29  ;;  %v1324_v41 = vld [vmem:[#allocation2 + $0x38] sm:$0xff]  ;;  %v974_v50 = vpop.f32.mrf.mxu0  ;;  %v1102_v51 = vpop.f32.mrf.mxu1 }
 0x135   : > { %v1356_v42 = vld [vmem:[#allocation2 + $0x138] sm:$0xff]  ;;  %v1395_v46 = vmul.f32 %v2687_v36, %v1324_v41  ;;  %1849 = vst.msk [vmem:[%s2708_s16 + $0x14] sm:$0xf] %vm1843_vm1, %v2128_v35  ;;  %v1529_v48 = vmax.f32 %v1465_v38, 0.0  ;;  %v1199_v54 = vadd.f32 %v974_v50, %v398_v34  ;;  %v1231_v55 = vadd.f32 %v1102_v51, %v430_v45  ;;  %v433_v41 = vld [vmem:[#allocation2 + $0x168] sm:$0xff] }
 0x136   : > { %v1427_v47 = vmul.f32 %v2687_v36, %v1356_v42  ;;  %1881 = vst.msk [vmem:[%s2708_s16 + $0x94] sm:$0xf] %vm1843_vm1, %v2160_v37  ;;  %v1561_v49 = vmax.f32 %v1497_v40, 0.0  ;;  %v1325_v58 = vld [vmem:[#allocation2 + $0x40] sm:$0xff]  ;;  %v976_v60 = vpop.f32.mrf.mxu0  ;;  %v1104_v61 = vpop.f32.mrf.mxu1  ;;  %v401_v40 = vld [vmem:[#allocation2 + $0x68] sm:$0xff] }
 0x137   : > { %v1466_v52 = vadd.f32 %v2692_v39, %v1395_v46  ;;  %v2129_v56 = vpack.c.bf16 %v1529_v48, %v1529_v48  ;;  %v1357_v59 = vld [vmem:[#allocation2 + $0x140] sm:$0xff]  ;;  %v1396_v0 = vmul.f32 %v2687_v36, %v1325_v58  ;;  %1263 = vst.msk [vmem:[#allocation2 + $0x50] sm:$0xff] %vm259_vm0, %v1199_v54  ;;  %1295 = vst.msk [vmem:[#allocation2 + $0x150] sm:$0xff] %vm259_vm0, %v1231_v55 }
 0x138   : > { %v1498_v53 = vadd.f32 %v2692_v39, %v1427_v47  ;;  %v2161_v57 = vpack.c.bf16 %v1561_v49, %v1561_v49  ;;  %v1428_v1 = vmul.f32 %v2687_v36, %v1357_v59  ;;  %v977_v4 = vpop.f32.mrf.mxu0  ;;  %v1105_v5 = vpop.f32.mrf.mxu1 }
 0x139   : > { %v1530_v62 = vmax.f32 %v1466_v52, 0.0  ;;  %1850 = vst.msk [vmem:[%s2708_s16 + $0x18] sm:$0xf] %vm1843_vm1, %v2129_v56  ;;  %v1467_v8 = vadd.f32 %v2692_v39, %v1396_v0  ;;  %v1200_v12 = vadd.f32 %v977_v4, %v399_v2  ;;  %v1232_v13 = vadd.f32 %v1105_v5, %v431_v3  ;;  %v402_v52 = vld [vmem:[#allocation2 + $0x70] sm:$0xff] }
 0x13a   : > { %v1562_v63 = vmax.f32 %v1498_v53, 0.0  ;;  %1882 = vst.msk [vmem:[%s2708_s16 + $0x98] sm:$0xf] %vm1843_vm1, %v2161_v57  ;;  %v1499_v9 = vadd.f32 %v2692_v39, %v1428_v1  ;;  %v1326_v10 = vld [vmem:[#allocation2 + $0x48] sm:$0xff]  ;;  %v979_v14 = vpop.f32.mrf.mxu0  ;;  %v1107_v15 = vpop.f32.mrf.mxu1  ;;  %v434_v53 = vld [vmem:[#allocation2 + $0x170] sm:$0xff] }
 0x13b   : > { %v2130_v6 = vpack.c.bf16 %v1530_v62, %v1530_v62  ;;  %v1358_v11 = vld [vmem:[#allocation2 + $0x148] sm:$0xff]  ;;  %v1531_v16 = vmax.f32 %v1467_v8, 0.0  ;;  %v1397_v18 = vmul.f32 %v2687_v36, %v1326_v10  ;;  %1264 = vst.msk [vmem:[#allocation2 + $0x58] sm:$0xff] %vm259_vm0, %v1200_v12  ;;  %1296 = vst.msk [vmem:[#allocation2 + $0x158] sm:$0xff] %vm259_vm0, %v1232_v13 }
 0x13c   : > { %v2162_v7 = vpack.c.bf16 %v1562_v63, %v1562_v63  ;;  %v1563_v17 = vmax.f32 %v1499_v9, 0.0  ;;  %v1429_v19 = vmul.f32 %v2687_v36, %v1358_v11  ;;  %v982_v22 = vpop.f32.mrf.mxu0  ;;  %v1110_v23 = vpop.f32.mrf.mxu1 }
 0x13d   : > { %1851 = vst.msk [vmem:[%s2708_s16 + $0x1c] sm:$0xf] %vm1843_vm1, %v2130_v6  ;;  %v2131_v24 = vpack.c.bf16 %v1531_v16, %v1531_v16  ;;  %v1468_v26 = vadd.f32 %v2692_v39, %v1397_v18  ;;  %v1201_v30 = vadd.f32 %v982_v22, %v400_v20  ;;  %v1233_v31 = vadd.f32 %v1110_v23, %v432_v21  ;;  %v403_v6 = vld [vmem:[#allocation2 + $0x78] sm:$0xff] }
 0x13e   : > { %1883 = vst.msk [vmem:[%s2708_s16 + $0x9c] sm:$0xf] %vm1843_vm1, %v2162_v7  ;;  %v2163_v25 = vpack.c.bf16 %v1563_v17, %v1563_v17  ;;  %v1500_v27 = vadd.f32 %v2692_v39, %v1429_v19  ;;  %v1327_v28 = vld [vmem:[#allocation2 + $0x50] sm:$0xff]  ;;  %v984_v32 = vpop.f32.mrf.mxu0  ;;  %v1112_v33 = vpop.f32.mrf.mxu1  ;;  %v435_v7 = vld [vmem:[#allocation2 + $0x178] sm:$0xff] }
 0x13f   : > { %v1359_v29 = vld [vmem:[#allocation2 + $0x150] sm:$0xff]  ;;  %1852 = vst.msk [vmem:[%s2708_s16 + $0x20] sm:$0xf] %vm1843_vm1, %v2131_v24  ;;  %v1532_v34 = vmax.f32 %v1468_v26, 0.0  ;;  %v1398_v37 = vmul.f32 %v2687_v36, %v1327_v28  ;;  %v404_v24 = vld [vmem:[#allocation2 + $0x80] sm:$0xff] }
 0x140   : > { %1884 = vst.msk [vmem:[%s2708_s16 + $0xa0] sm:$0xf] %vm1843_vm1, %v2163_v25  ;;  %v1564_v35 = vmax.f32 %v1500_v27, 0.0  ;;  %v1430_v38 = vmul.f32 %v2687_v36, %v1359_v29  ;;  %v985_v42 = vpop.f32.mrf.mxu0  ;;  %v1113_v43 = vpop.f32.mrf.mxu1  ;;  %v436_v25 = vld [vmem:[#allocation2 + $0x180] sm:$0xff] }
 0x141   : > { %1265 = vst.msk [vmem:[#allocation2 + $0x60] sm:$0xff] %vm259_vm0, %v1201_v30  ;;  %1297 = vst.msk [vmem:[#allocation2 + $0x160] sm:$0xff] %vm259_vm0, %v1233_v31  ;;  %v2132_v44 = vpack.c.bf16 %v1532_v34, %v1532_v34  ;;  %v1469_v46 = vadd.f32 %v2692_v39, %v1398_v37  ;;  %v1202_v48 = vadd.f32 %v985_v42, %v401_v40  ;;  %v405_v37 = vld [vmem:[#allocation2 + $0x88] sm:$0xff] }
 0x142   : > { %v2164_v45 = vpack.c.bf16 %v1564_v35, %v1564_v35  ;;  %v1501_v47 = vadd.f32 %v2692_v39, %v1430_v38  ;;  %v1234_v49 = vadd.f32 %v1113_v43, %v433_v41  ;;  %v987_v50 = vpop.f32.mrf.mxu0  ;;  %v1115_v51 = vpop.f32.mrf.mxu1  ;;  %v1328_v56 = vld [vmem:[#allocation2 + $0x58] sm:$0xff] }
 0x143   : > { %1853 = vst.msk [vmem:[%s2708_s16 + $0x24] sm:$0xf] %vm1843_vm1, %v2132_v44  ;;  %v1533_v54 = vmax.f32 %v1469_v46, 0.0  ;;  %v1360_v57 = vld [vmem:[#allocation2 + $0x158] sm:$0xff]  ;;  %v1399_v58 = vmul.f32 %v2687_v36, %v1328_v56 }
 0x144   : > { %1885 = vst.msk [vmem:[%s2708_s16 + $0xa4] sm:$0xf] %vm1843_vm1, %v2164_v45  ;;  %v1565_v55 = vmax.f32 %v1501_v47, 0.0  ;;  %v1431_v59 = vmul.f32 %v2687_v36, %v1360_v57  ;;  %v990_v60 = vpop.f32.mrf.mxu0  ;;  %v1118_v61 = vpop.f32.mrf.mxu1  ;;  %v437_v47 = vld [vmem:[#allocation2 + $0x188] sm:$0xff] }
 0x145   : > { %1266 = vst.msk [vmem:[#allocation2 + $0x68] sm:$0xff] %vm259_vm0, %v1202_v48  ;;  %1298 = vst.msk [vmem:[#allocation2 + $0x168] sm:$0xff] %vm259_vm0, %v1234_v49  ;;  %v2133_v62 = vpack.c.bf16 %v1533_v54, %v1533_v54  ;;  %v1203_v0 = vadd.f32 %v990_v60, %v402_v52  ;;  %v1235_v1 = vadd.f32 %v1118_v61, %v434_v53 }
 0x146   : > { %v2165_v63 = vpack.c.bf16 %v1565_v55, %v1565_v55  ;;  %v1470_v2 = vadd.f32 %v2692_v39, %v1399_v58  ;;  %v1502_v3 = vadd.f32 %v2692_v39, %v1431_v59  ;;  %v992_v4 = vpop.f32.mrf.mxu0  ;;  %v1120_v5 = vpop.f32.mrf.mxu1 }
 0x147   : > { %1854 = vst.msk [vmem:[%s2708_s16 + $0x28] sm:$0xf] %vm1843_vm1, %v2133_v62  ;;  %v406_v4 = vld [vmem:[#allocation2 + $0x90] sm:$0xff] }
 0x148   : > { %1886 = vst.msk [vmem:[%s2708_s16 + $0xa8] sm:$0xf] %vm1843_vm1, %v2165_v63  ;;  %v1329_v8 = vld [vmem:[#allocation2 + $0x60] sm:$0xff]  ;;  %v1534_v10 = vmax.f32 %v1470_v2, 0.0  ;;  %v1566_v11 = vmax.f32 %v1502_v3, 0.0  ;;  %v993_v14 = vpop.f32.mrf.mxu0  ;;  %v1121_v15 = vpop.f32.mrf.mxu1  ;;  %v438_v5 = vld [vmem:[#allocation2 + $0x190] sm:$0xff] }
 0x149   : > { %v1361_v9 = vld [vmem:[#allocation2 + $0x160] sm:$0xff]  ;;  %1267 = vst.msk [vmem:[#allocation2 + $0x70] sm:$0xff] %vm259_vm0, %v1203_v0  ;;  %1299 = vst.msk [vmem:[#allocation2 + $0x170] sm:$0xff] %vm259_vm0, %v1235_v1  ;;  %v1400_v12 = vmul.f32 %v2687_v36, %v1329_v8  ;;  %v1204_v16 = vadd.f32 %v993_v14, %v403_v6  ;;  %v1236_v17 = vadd.f32 %v1121_v15, %v435_v7 }
 0x14a   : > { %v1432_v13 = vmul.f32 %v2687_v36, %v1361_v9  ;;  %v2134_v18 = vpack.c.bf16 %v1534_v10, %v1534_v10  ;;  %v2166_v19 = vpack.c.bf16 %v1566_v11, %v1566_v11  ;;  %v995_v22 = vpop.f32.mrf.mxu0  ;;  %v1123_v23 = vpop.f32.mrf.mxu1 }
 0x14b   : > { %v1471_v20 = vadd.f32 %v2692_v39, %v1400_v12  ;;  %1268 = vst.msk [vmem:[#allocation2 + $0x78] sm:$0xff] %vm259_vm0, %v1204_v16  ;;  %1300 = vst.msk [vmem:[#allocation2 + $0x178] sm:$0xff] %vm259_vm0, %v1236_v17  ;;  %v407_v22 = vld [vmem:[#allocation2 + $0x98] sm:$0xff] }
 0x14c   : > { %v1503_v21 = vadd.f32 %v2692_v39, %v1432_v13  ;;  %v1330_v26 = vld [vmem:[#allocation2 + $0x68] sm:$0xff]  ;;  %1855 = vst.msk [vmem:[%s2708_s16 + $0x2c] sm:$0xf] %vm1843_vm1, %v2134_v18  ;;  %1887 = vst.msk [vmem:[%s2708_s16 + $0xac] sm:$0xf] %vm1843_vm1, %v2166_v19  ;;  %v998_v32 = vpop.f32.mrf.mxu0  ;;  %v1126_v33 = vpop.f32.mrf.mxu1  ;;  %v439_v23 = vld [vmem:[#allocation2 + $0x198] sm:$0xff] }
 0x14d   : > { %v1362_v27 = vld [vmem:[#allocation2 + $0x168] sm:$0xff]  ;;  %v1535_v28 = vmax.f32 %v1471_v20, 0.0  ;;  %v1401_v30 = vmul.f32 %v2687_v36, %v1330_v26  ;;  %v1205_v34 = vadd.f32 %v998_v32, %v404_v24  ;;  %v1237_v35 = vadd.f32 %v1126_v33, %v436_v25 }
 0x14e   : > { %v1567_v29 = vmax.f32 %v1503_v21, 0.0  ;;  %v1433_v31 = vmul.f32 %v2687_v36, %v1362_v27  ;;  %v1000_v45 = vpop.f32.mrf.mxu0  ;;  %v1128_v46 = vpop.f32.mrf.mxu1 }
 0x14f   : > { %v2135_v38 = vpack.c.bf16 %v1535_v28, %v1535_v28  ;;  %v1472_v41 = vadd.f32 %v2692_v39, %v1401_v30  ;;  %1269 = vst.msk [vmem:[#allocation2 + $0x80] sm:$0xff] %vm259_vm0, %v1205_v34  ;;  %1301 = vst.msk [vmem:[#allocation2 + $0x180] sm:$0xff] %vm259_vm0, %v1237_v35 }
 0x150   : > { %v2167_v40 = vpack.c.bf16 %v1567_v29, %v1567_v29  ;;  %v1504_v42 = vadd.f32 %v2692_v39, %v1433_v31  ;;  %v1331_v43 = vld [vmem:[#allocation2 + $0x70] sm:$0xff]  ;;  %v1001_v52 = vpop.f32.mrf.mxu0  ;;  %v1129_v53 = vpop.f32.mrf.mxu1 }
 0x151   : > { %v1363_v44 = vld [vmem:[#allocation2 + $0x170] sm:$0xff]  ;;  %v1402_v48 = vmul.f32 %v2687_v36, %v1331_v43  ;;  %1856 = vst.msk [vmem:[%s2708_s16 + $0x30] sm:$0xf] %vm1843_vm1, %v2135_v38  ;;  %v1536_v50 = vmax.f32 %v1472_v41, 0.0  ;;  %v1206_v56 = vadd.f32 %v1001_v52, %v405_v37  ;;  %v1238_v57 = vadd.f32 %v1129_v53, %v437_v47  ;;  %v440_v43 = vld [vmem:[#allocation2 + $0x1a0] sm:$0xff] }
 0x152   : > { %v1434_v49 = vmul.f32 %v2687_v36, %v1363_v44  ;;  %1888 = vst.msk [vmem:[%s2708_s16 + $0xb0] sm:$0xf] %vm1843_vm1, %v2167_v40  ;;  %v1568_v51 = vmax.f32 %v1504_v42, 0.0  ;;  %v1332_v60 = vld [vmem:[#allocation2 + $0x78] sm:$0xff]  ;;  %v1003_v62 = vpop.f32.mrf.mxu0  ;;  %v1131_v63 = vpop.f32.mrf.mxu1  ;;  %v408_v42 = vld [vmem:[#allocation2 + $0xa0] sm:$0xff] }
 0x153   : > { %v1473_v54 = vadd.f32 %v2692_v39, %v1402_v48  ;;  %v2136_v58 = vpack.c.bf16 %v1536_v50, %v1536_v50  ;;  %v1364_v61 = vld [vmem:[#allocation2 + $0x178] sm:$0xff]  ;;  %v1403_v2 = vmul.f32 %v2687_v36, %v1332_v60  ;;  %1270 = vst.msk [vmem:[#allocation2 + $0x88] sm:$0xff] %vm259_vm0, %v1206_v56  ;;  %1302 = vst.msk [vmem:[#allocation2 + $0x188] sm:$0xff] %vm259_vm0, %v1238_v57 }
 0x154   : > { %v1505_v55 = vadd.f32 %v2692_v39, %v1434_v49  ;;  %v2168_v59 = vpack.c.bf16 %v1568_v51, %v1568_v51  ;;  %v1435_v3 = vmul.f32 %v2687_v36, %v1364_v61  ;;  %v1006_v6 = vpop.f32.mrf.mxu0  ;;  %v1134_v7 = vpop.f32.mrf.mxu1 }
 0x155   : > { %v1537_v0 = vmax.f32 %v1473_v54, 0.0  ;;  %1857 = vst.msk [vmem:[%s2708_s16 + $0x34] sm:$0xf] %vm1843_vm1, %v2136_v58  ;;  %v1474_v10 = vadd.f32 %v2692_v39, %v1403_v2  ;;  %v1207_v14 = vadd.f32 %v1006_v6, %v406_v4  ;;  %v1239_v15 = vadd.f32 %v1134_v7, %v438_v5  ;;  %v409_v54 = vld [vmem:[#allocation2 + $0xa8] sm:$0xff] }
 0x156   : > { %v1569_v1 = vmax.f32 %v1505_v55, 0.0  ;;  %1889 = vst.msk [vmem:[%s2708_s16 + $0xb4] sm:$0xf] %vm1843_vm1, %v2168_v59  ;;  %v1506_v11 = vadd.f32 %v2692_v39, %v1435_v3  ;;  %v1333_v12 = vld [vmem:[#allocation2 + $0x80] sm:$0xff]  ;;  %v1008_v16 = vpop.f32.mrf.mxu0  ;;  %v1136_v17 = vpop.f32.mrf.mxu1  ;;  %v441_v55 = vld [vmem:[#allocation2 + $0x1a8] sm:$0xff] }
 0x157   : > { %v2137_v8 = vpack.c.bf16 %v1537_v0, %v1537_v0  ;;  %v1365_v13 = vld [vmem:[#allocation2 + $0x180] sm:$0xff]  ;;  %v1538_v18 = vmax.f32 %v1474_v10, 0.0  ;;  %v1404_v20 = vmul.f32 %v2687_v36, %v1333_v12  ;;  %1271 = vst.msk [vmem:[#allocation2 + $0x90] sm:$0xff] %vm259_vm0, %v1207_v14  ;;  %1303 = vst.msk [vmem:[#allocation2 + $0x190] sm:$0xff] %vm259_vm0, %v1239_v15 }
 0x158   : > { %v2169_v9 = vpack.c.bf16 %v1569_v1, %v1569_v1  ;;  %v1570_v19 = vmax.f32 %v1506_v11, 0.0  ;;  %v1436_v21 = vmul.f32 %v2687_v36, %v1365_v13  ;;  %v1009_v24 = vpop.f32.mrf.mxu0  ;;  %v1137_v25 = vpop.f32.mrf.mxu1 }
 0x159   : > { %1858 = vst.msk [vmem:[%s2708_s16 + $0x38] sm:$0xf] %vm1843_vm1, %v2137_v8  ;;  %v2138_v26 = vpack.c.bf16 %v1538_v18, %v1538_v18  ;;  %v1475_v28 = vadd.f32 %v2692_v39, %v1404_v20  ;;  %v1208_v32 = vadd.f32 %v1009_v24, %v407_v22  ;;  %v1240_v33 = vadd.f32 %v1137_v25, %v439_v23  ;;  %v410_v8 = vld [vmem:[#allocation2 + $0xb0] sm:$0xff] }
 0x15a   : > { %1890 = vst.msk [vmem:[%s2708_s16 + $0xb8] sm:$0xf] %vm1843_vm1, %v2169_v9  ;;  %v2170_v27 = vpack.c.bf16 %v1570_v19, %v1570_v19  ;;  %v1507_v29 = vadd.f32 %v2692_v39, %v1436_v21  ;;  %v1334_v30 = vld [vmem:[#allocation2 + $0x88] sm:$0xff]  ;;  %v1011_v34 = vpop.f32.mrf.mxu0  ;;  %v1139_v35 = vpop.f32.mrf.mxu1  ;;  %v442_v9 = vld [vmem:[#allocation2 + $0x1b0] sm:$0xff] }
 0x15b   : > { %v1366_v31 = vld [vmem:[#allocation2 + $0x188] sm:$0xff]  ;;  %1859 = vst.msk [vmem:[%s2708_s16 + $0x3c] sm:$0xf] %vm1843_vm1, %v2138_v26  ;;  %v1539_v37 = vmax.f32 %v1475_v28, 0.0  ;;  %v1405_v40 = vmul.f32 %v2687_v36, %v1334_v30  ;;  %v411_v26 = vld [vmem:[#allocation2 + $0xb8] sm:$0xff] }
 0x15c   : > { %1891 = vst.msk [vmem:[%s2708_s16 + $0xbc] sm:$0xf] %vm1843_vm1, %v2170_v27  ;;  %v1571_v38 = vmax.f32 %v1507_v29, 0.0  ;;  %v1437_v41 = vmul.f32 %v2687_v36, %v1366_v31  ;;  %v1014_v44 = vpop.f32.mrf.mxu0  ;;  %v1142_v45 = vpop.f32.mrf.mxu1  ;;  %v443_v27 = vld [vmem:[#allocation2 + $0x1b8] sm:$0xff] }
 0x15d   : > { %1272 = vst.msk [vmem:[#allocation2 + $0x98] sm:$0xff] %vm259_vm0, %v1208_v32  ;;  %1304 = vst.msk [vmem:[#allocation2 + $0x198] sm:$0xff] %vm259_vm0, %v1240_v33  ;;  %v2139_v46 = vpack.c.bf16 %v1539_v37, %v1539_v37  ;;  %v1476_v48 = vadd.f32 %v2692_v39, %v1405_v40  ;;  %v1209_v50 = vadd.f32 %v1014_v44, %v408_v42  ;;  %v412_v40 = vld [vmem:[#allocation2 + $0xc0] sm:$0xff] }
 0x15e   : > { %v2171_v47 = vpack.c.bf16 %v1571_v38, %v1571_v38  ;;  %v1508_v49 = vadd.f32 %v2692_v39, %v1437_v41  ;;  %v1241_v51 = vadd.f32 %v1142_v45, %v440_v43  ;;  %v1016_v52 = vpop.f32.mrf.mxu0  ;;  %v1144_v53 = vpop.f32.mrf.mxu1  ;;  %v1335_v58 = vld [vmem:[#allocation2 + $0x90] sm:$0xff] }
 0x15f   : > { %1860 = vst.msk [vmem:[%s2708_s16 + $0x40] sm:$0xf] %vm1843_vm1, %v2139_v46  ;;  %v1540_v56 = vmax.f32 %v1476_v48, 0.0  ;;  %v1367_v59 = vld [vmem:[#allocation2 + $0x190] sm:$0xff]  ;;  %v1406_v60 = vmul.f32 %v2687_v36, %v1335_v58 }
 0x160   : > { %1892 = vst.msk [vmem:[%s2708_s16 + $0xc0] sm:$0xf] %vm1843_vm1, %v2171_v47  ;;  %v1572_v57 = vmax.f32 %v1508_v49, 0.0  ;;  %v1438_v61 = vmul.f32 %v2687_v36, %v1367_v59  ;;  %v1017_v62 = vpop.f32.mrf.mxu0  ;;  %v1145_v63 = vpop.f32.mrf.mxu1  ;;  %v444_v49 = vld [vmem:[#allocation2 + $0x1c0] sm:$0xff] }
 0x161   : > { %1273 = vst.msk [vmem:[#allocation2 + $0xa0] sm:$0xff] %vm259_vm0, %v1209_v50  ;;  %1305 = vst.msk [vmem:[#allocation2 + $0x1a0] sm:$0xff] %vm259_vm0, %v1241_v51  ;;  %v2140_v0 = vpack.c.bf16 %v1540_v56, %v1540_v56  ;;  %v1210_v2 = vadd.f32 %v1017_v62, %v409_v54  ;;  %v1242_v3 = vadd.f32 %v1145_v63, %v441_v55 }
 0x162   : > { %v2172_v1 = vpack.c.bf16 %v1572_v57, %v1572_v57  ;;  %v1477_v4 = vadd.f32 %v2692_v39, %v1406_v60  ;;  %v1509_v5 = vadd.f32 %v2692_v39, %v1438_v61  ;;  %v1019_v6 = vpop.f32.mrf.mxu0  ;;  %v1147_v7 = vpop.f32.mrf.mxu1 }
 0x163   : > { %1861 = vst.msk [vmem:[%s2708_s16 + $0x44] sm:$0xf] %vm1843_vm1, %v2140_v0  ;;  %v413_v6 = vld [vmem:[#allocation2 + $0xc8] sm:$0xff] }
 0x164   : > { %1893 = vst.msk [vmem:[%s2708_s16 + $0xc4] sm:$0xf] %vm1843_vm1, %v2172_v1  ;;  %v1336_v10 = vld [vmem:[#allocation2 + $0x98] sm:$0xff]  ;;  %v1541_v12 = vmax.f32 %v1477_v4, 0.0  ;;  %v1573_v13 = vmax.f32 %v1509_v5, 0.0  ;;  %v1022_v16 = vpop.f32.mrf.mxu0  ;;  %v1150_v17 = vpop.f32.mrf.mxu1  ;;  %v445_v7 = vld [vmem:[#allocation2 + $0x1c8] sm:$0xff] }
 0x165   : > { %v1368_v11 = vld [vmem:[#allocation2 + $0x198] sm:$0xff]  ;;  %1274 = vst.msk [vmem:[#allocation2 + $0xa8] sm:$0xff] %vm259_vm0, %v1210_v2  ;;  %1306 = vst.msk [vmem:[#allocation2 + $0x1a8] sm:$0xff] %vm259_vm0, %v1242_v3  ;;  %v1407_v14 = vmul.f32 %v2687_v36, %v1336_v10  ;;  %v1211_v18 = vadd.f32 %v1022_v16, %v410_v8  ;;  %v1243_v19 = vadd.f32 %v1150_v17, %v442_v9 }
 0x166   : > { %v1439_v15 = vmul.f32 %v2687_v36, %v1368_v11  ;;  %v2141_v20 = vpack.c.bf16 %v1541_v12, %v1541_v12  ;;  %v2173_v21 = vpack.c.bf16 %v1573_v13, %v1573_v13  ;;  %v1024_v24 = vpop.f32.mrf.mxu0  ;;  %v1152_v25 = vpop.f32.mrf.mxu1 }
 0x167   : > { %v1478_v22 = vadd.f32 %v2692_v39, %v1407_v14  ;;  %1275 = vst.msk [vmem:[#allocation2 + $0xb0] sm:$0xff] %vm259_vm0, %v1211_v18  ;;  %1307 = vst.msk [vmem:[#allocation2 + $0x1b0] sm:$0xff] %vm259_vm0, %v1243_v19  ;;  %v446_v24 = vld [vmem:[#allocation2 + $0x1d0] sm:$0xff] }
 0x168   : > { %v1510_v23 = vadd.f32 %v2692_v39, %v1439_v15  ;;  %v1337_v28 = vld [vmem:[#allocation2 + $0xa0] sm:$0xff]  ;;  %1862 = vst.msk [vmem:[%s2708_s16 + $0x48] sm:$0xf] %vm1843_vm1, %v2141_v20  ;;  %1894 = vst.msk [vmem:[%s2708_s16 + $0xc8] sm:$0xf] %vm1843_vm1, %v2173_v21  ;;  %v1025_v34 = vpop.f32.mrf.mxu0  ;;  %v1153_v35 = vpop.f32.mrf.mxu1 }
 0x169   : > { %v1369_v29 = vld [vmem:[#allocation2 + $0x1a0] sm:$0xff]  ;;  %v1542_v30 = vmax.f32 %v1478_v22, 0.0  ;;  %v1408_v32 = vmul.f32 %v2687_v36, %v1337_v28  ;;  %v1212_v37 = vadd.f32 %v1025_v34, %v411_v26  ;;  %v1244_v38 = vadd.f32 %v1153_v35, %v443_v27 }
 0x16a   : > { %v1574_v31 = vmax.f32 %v1510_v23, 0.0  ;;  %v1440_v33 = vmul.f32 %v2687_v36, %v1369_v29  ;;  %v1027_v47 = vpop.f32.mrf.mxu0  ;;  %v1155_v48 = vpop.f32.mrf.mxu1  ;;  %v2929_v21 = vld [vmem:[%s3033_s4] ss:$0 sm:$0xff]  ;;  %v414_v23 = vld [vmem:[#allocation2 + $0xd0] sm:$0xff] }
 0x16b   : > { %v2142_v41 = vpack.c.bf16 %v1542_v30, %v1542_v30  ;;  %v1479_v43 = vadd.f32 %v2692_v39, %v1408_v32  ;;  %1276 = vst.msk [vmem:[#allocation2 + $0xb8] sm:$0xff] %vm259_vm0, %v1212_v37  ;;  %1308 = vst.msk [vmem:[#allocation2 + $0x1b8] sm:$0xff] %vm259_vm0, %v1244_v38  ;;  %v2938_v29 = vld [vmem:[%s3034_s5] ss:$0 sm:$0xff] }
 0x16c   : > { %v2174_v42 = vpack.c.bf16 %v1574_v31, %v1574_v31  ;;  %v1511_v44 = vadd.f32 %v2692_v39, %v1440_v33  ;;  %v1338_v45 = vld [vmem:[#allocation2 + $0xa8] sm:$0xff]  ;;  %v1030_v54 = vpop.f32.mrf.mxu0  ;;  %v1158_v55 = vpop.f32.mrf.mxu1 }
 0x16d   : > { %v1370_v46 = vld [vmem:[#allocation2 + $0x1a8] sm:$0xff]  ;;  %v1409_v50 = vmul.f32 %v2687_v36, %v1338_v45  ;;  %1863 = vst.msk [vmem:[%s2708_s16 + $0x4c] sm:$0xf] %vm1843_vm1, %v2142_v41  ;;  %v1543_v52 = vmax.f32 %v1479_v43, 0.0  ;;  %v1213_v58 = vadd.f32 %v1030_v54, %v412_v40  ;;  %v1245_v59 = vadd.f32 %v1158_v55, %v444_v49  ;;  %v447_v45 = vld [vmem:[#allocation2 + $0x1d8] sm:$0xff] }
 0x16e   : > { %v1441_v51 = vmul.f32 %v2687_v36, %v1370_v46  ;;  %1895 = vst.msk [vmem:[%s2708_s16 + $0xcc] sm:$0xf] %vm1843_vm1, %v2174_v42  ;;  %v1575_v53 = vmax.f32 %v1511_v44, 0.0  ;;  %v1339_v62 = vld [vmem:[#allocation2 + $0xb0] sm:$0xff]  ;;  %v1032_v0 = vpop.f32.mrf.mxu0  ;;  %v1160_v1 = vpop.f32.mrf.mxu1  ;;  %v415_v44 = vld [vmem:[#allocation2 + $0xd8] sm:$0xff] }
 0x16f   : > { %v1480_v56 = vadd.f32 %v2692_v39, %v1409_v50  ;;  %v2143_v60 = vpack.c.bf16 %v1543_v52, %v1543_v52  ;;  %v1371_v63 = vld [vmem:[#allocation2 + $0x1b0] sm:$0xff]  ;;  %v1410_v4 = vmul.f32 %v2687_v36, %v1339_v62  ;;  %1277 = vst.msk [vmem:[#allocation2 + $0xc0] sm:$0xff] %vm259_vm0, %v1213_v58  ;;  %1309 = vst.msk [vmem:[#allocation2 + $0x1c0] sm:$0xff] %vm259_vm0, %v1245_v59 }
 0x170   : > { %v1512_v57 = vadd.f32 %v2692_v39, %v1441_v51  ;;  %v2175_v61 = vpack.c.bf16 %v1575_v53, %v1575_v53  ;;  %v1442_v5 = vmul.f32 %v2687_v36, %v1371_v63  ;;  %v1033_v8 = vpop.f32.mrf.mxu0  ;;  %v1161_v9 = vpop.f32.mrf.mxu1 }
 0x171   : > { %v1544_v2 = vmax.f32 %v1480_v56, 0.0  ;;  %1864 = vst.msk [vmem:[%s2708_s16 + $0x50] sm:$0xf] %vm1843_vm1, %v2143_v60  ;;  %v1481_v12 = vadd.f32 %v2692_v39, %v1410_v4  ;;  %v1214_v15 = vadd.f32 %v1033_v8, %v413_v6  ;;  %v1246_v16 = vadd.f32 %v1161_v9, %v445_v7  ;;  %v416_v56 = vld [vmem:[#allocation2 + $0xe0] sm:$0xff] }
 0x172   : > { %v1576_v3 = vmax.f32 %v1512_v57, 0.0  ;;  %1896 = vst.msk [vmem:[%s2708_s16 + $0xd0] sm:$0xf] %vm1843_vm1, %v2175_v61  ;;  %v1513_v36 = vadd.f32 %v2692_v39, %v1442_v5  ;;  %v1340_v13 = vld [vmem:[#allocation2 + $0xb8] sm:$0xff]  ;;  %v1035_v17 = vpop.f32.mrf.mxu0  ;;  %v1163_v18 = vpop.f32.mrf.mxu1  ;;  %v448_v57 = vld [vmem:[#allocation2 + $0x1e0] sm:$0xff] }
 0x173   : > { %v2144_v10 = vpack.c.bf16 %v1544_v2, %v1544_v2  ;;  %v1372_v14 = vld [vmem:[#allocation2 + $0x1b8] sm:$0xff]  ;;  %v1545_v19 = vmax.f32 %v1481_v12, 0.0  ;;  %v1411_v22 = vmul.f32 %v2929_v21, %v1340_v13  ;;  %1278 = vst.msk [vmem:[#allocation2 + $0xc8] sm:$0xff] %vm259_vm0, %v1214_v15  ;;  %1310 = vst.msk [vmem:[#allocation2 + $0x1c8] sm:$0xff] %vm259_vm0, %v1246_v16 }
 0x174   : > { %v2176_v11 = vpack.c.bf16 %v1576_v3, %v1576_v3  ;;  %v1577_v20 = vmax.f32 %v1513_v36, 0.0  ;;  %v1443_v39 = vmul.f32 %v2929_v21, %v1372_v14  ;;  %v1038_v25 = vpop.f32.mrf.mxu0  ;;  %v1166_v26 = vpop.f32.mrf.mxu1 }
 0x175   : > { %1865 = vst.msk [vmem:[%s2708_s16 + $0x54] sm:$0xf] %vm1843_vm1, %v2144_v10  ;;  %v2145_v27 = vpack.c.bf16 %v1545_v19, %v1545_v19  ;;  %v1482_v30 = vadd.f32 %v2938_v29, %v1411_v22  ;;  %v1215_v34 = vadd.f32 %v1038_v25, %v414_v23  ;;  %v1247_v35 = vadd.f32 %v1166_v26, %v446_v24  ;;  %v417_v10 = vld [vmem:[#allocation2 + $0xe8] sm:$0xff] }
 0x176   : > { %1897 = vst.msk [vmem:[%s2708_s16 + $0xd4] sm:$0xf] %vm1843_vm1, %v2176_v11  ;;  %v2177_v28 = vpack.c.bf16 %v1577_v20, %v1577_v20  ;;  %v1514_v31 = vadd.f32 %v2938_v29, %v1443_v39  ;;  %v1341_v32 = vld [vmem:[#allocation2 + $0xc0] sm:$0xff]  ;;  %v1040_v37 = vpop.f32.mrf.mxu0  ;;  %v1168_v38 = vpop.f32.mrf.mxu1  ;;  %v449_v11 = vld [vmem:[#allocation2 + $0x1e8] sm:$0xff] }
 0x177   : > { %v1373_v33 = vld [vmem:[#allocation2 + $0x1c0] sm:$0xff]  ;;  %1866 = vst.msk [vmem:[%s2708_s16 + $0x58] sm:$0xf] %vm1843_vm1, %v2145_v27  ;;  %v1546_v40 = vmax.f32 %v1482_v30, 0.0  ;;  %v1412_v42 = vmul.f32 %v2929_v21, %v1341_v32  ;;  %v418_v27 = vld [vmem:[#allocation2 + $0xf0] sm:$0xff] }
 0x178   : > { %1898 = vst.msk [vmem:[%s2708_s16 + $0xd8] sm:$0xf] %vm1843_vm1, %v2177_v28  ;;  %v1578_v41 = vmax.f32 %v1514_v31, 0.0  ;;  %v1444_v43 = vmul.f32 %v2929_v21, %v1373_v33  ;;  %v1041_v46 = vpop.f32.mrf.mxu0  ;;  %v1169_v47 = vpop.f32.mrf.mxu1  ;;  %v450_v28 = vld [vmem:[#allocation2 + $0x1f0] sm:$0xff] }
 0x179   : > { %1279 = vst.msk [vmem:[#allocation2 + $0xd0] sm:$0xff] %vm259_vm0, %v1215_v34  ;;  %1311 = vst.msk [vmem:[#allocation2 + $0x1d0] sm:$0xff] %vm259_vm0, %v1247_v35  ;;  %v2146_v48 = vpack.c.bf16 %v1546_v40, %v1546_v40  ;;  %v1483_v50 = vadd.f32 %v2938_v29, %v1412_v42  ;;  %v1216_v52 = vadd.f32 %v1041_v46, %v415_v44  ;;  %v419_v42 = vld [vmem:[#allocation2 + $0xf8] sm:$0xff] }
 0x17a   : > { %v2178_v49 = vpack.c.bf16 %v1578_v41, %v1578_v41  ;;  %v1515_v51 = vadd.f32 %v2938_v29, %v1444_v43  ;;  %v1248_v53 = vadd.f32 %v1169_v47, %v447_v45  ;;  %v1043_v54 = vpop.f32.mrf.mxu0  ;;  %v1171_v55 = vpop.f32.mrf.mxu1  ;;  %v1342_v60 = vld [vmem:[#allocation2 + $0xc8] sm:$0xff] }
 0x17b   : > { %1867 = vst.msk [vmem:[%s2708_s16 + $0x5c] sm:$0xf] %vm1843_vm1, %v2146_v48  ;;  %v1547_v58 = vmax.f32 %v1483_v50, 0.0  ;;  %v1374_v61 = vld [vmem:[#allocation2 + $0x1c8] sm:$0xff]  ;;  %v1413_v62 = vmul.f32 %v2929_v21, %v1342_v60 }
 0x17c   : > { %1899 = vst.msk [vmem:[%s2708_s16 + $0xdc] sm:$0xf] %vm1843_vm1, %v2178_v49  ;;  %v1579_v59 = vmax.f32 %v1515_v51, 0.0  ;;  %v1445_v63 = vmul.f32 %v2929_v21, %v1374_v61  ;;  %v1046_v0 = vpop.f32.mrf.mxu0  ;;  %v1174_v1 = vpop.f32.mrf.mxu1  ;;  %v451_v51 = vld [vmem:[#allocation2 + $0x1f8] sm:$0xff] }
 0x17d   : > { %1280 = vst.msk [vmem:[#allocation2 + $0xd8] sm:$0xff] %vm259_vm0, %v1216_v52  ;;  %1312 = vst.msk [vmem:[#allocation2 + $0x1d8] sm:$0xff] %vm259_vm0, %v1248_v53  ;;  %v2147_v2 = vpack.c.bf16 %v1547_v58, %v1547_v58  ;;  %v1217_v4 = vadd.f32 %v1046_v0, %v416_v56  ;;  %v1249_v5 = vadd.f32 %v1174_v1, %v448_v57 }
 0x17e   : > { %v2179_v3 = vpack.c.bf16 %v1579_v59, %v1579_v59  ;;  %v1484_v6 = vadd.f32 %v2938_v29, %v1413_v62  ;;  %v1516_v7 = vadd.f32 %v2938_v29, %v1445_v63  ;;  %v1048_v8 = vpop.f32.mrf.mxu0  ;;  %v1176_v9 = vpop.f32.mrf.mxu1 }
 0x17f   : > { %1868 = vst.msk [vmem:[%s2708_s16 + $0x60] sm:$0xf] %vm1843_vm1, %v2147_v2 }
 0x180   : > { %1900 = vst.msk [vmem:[%s2708_s16 + $0xe0] sm:$0xf] %vm1843_vm1, %v2179_v3  ;;  %v1343_v12 = vld [vmem:[#allocation2 + $0xd0] sm:$0xff]  ;;  %v1548_v13 = vmax.f32 %v1484_v6, 0.0  ;;  %v1580_v14 = vmax.f32 %v1516_v7, 0.0  ;;  %v1049_v17 = vpop.f32.mrf.mxu0  ;;  %v1177_v18 = vpop.f32.mrf.mxu1 }
 0x181   : > { %v1375_v36 = vld [vmem:[#allocation2 + $0x1d0] sm:$0xff]  ;;  %1281 = vst.msk [vmem:[#allocation2 + $0xe0] sm:$0xff] %vm259_vm0, %v1217_v4  ;;  %1313 = vst.msk [vmem:[#allocation2 + $0x1e0] sm:$0xff] %vm259_vm0, %v1249_v5  ;;  %v1414_v15 = vmul.f32 %v2929_v21, %v1343_v12  ;;  %v1218_v19 = vadd.f32 %v1049_v17, %v417_v10  ;;  %v1250_v20 = vadd.f32 %v1177_v18, %v449_v11 }
 0x182   : > { %v1446_v16 = vmul.f32 %v2929_v21, %v1375_v36  ;;  %v2148_v22 = vpack.c.bf16 %v1548_v13, %v1548_v13  ;;  %v2180_v39 = vpack.c.bf16 %v1580_v14, %v1580_v14  ;;  %v1051_v25 = vpop.f32.mrf.mxu0  ;;  %v1179_v26 = vpop.f32.mrf.mxu1 }
 0x183   : > { %v1485_v23 = vadd.f32 %v2938_v29, %v1414_v15  ;;  %1282 = vst.msk [vmem:[#allocation2 + $0xe8] sm:$0xff] %vm259_vm0, %v1218_v19  ;;  %1314 = vst.msk [vmem:[#allocation2 + $0x1e8] sm:$0xff] %vm259_vm0, %v1250_v20 }
 0x184   : > { %v1517_v24 = vadd.f32 %v2938_v29, %v1446_v16  ;;  %v1344_v30 = vld [vmem:[#allocation2 + $0xd8] sm:$0xff]  ;;  %1869 = vst.msk [vmem:[%s2708_s16 + $0x64] sm:$0xf] %vm1843_vm1, %v2148_v22  ;;  %1901 = vst.msk [vmem:[%s2708_s16 + $0xe4] sm:$0xf] %vm1843_vm1, %v2180_v39  ;;  %v1054_v37 = vpop.f32.mrf.mxu0  ;;  %v1182_v38 = vpop.f32.mrf.mxu1 }
 0x185   : > { %v1376_v31 = vld [vmem:[#allocation2 + $0x1d8] sm:$0xff]  ;;  %v1549_v32 = vmax.f32 %v1485_v23, 0.0  ;;  %v1415_v34 = vmul.f32 %v2929_v21, %v1344_v30  ;;  %v1219_v40 = vadd.f32 %v1054_v37, %v418_v27  ;;  %v1251_v41 = vadd.f32 %v1182_v38, %v450_v28 }
 0x186   : > { %v1581_v33 = vmax.f32 %v1517_v24, 0.0  ;;  %v1447_v35 = vmul.f32 %v2929_v21, %v1376_v31  ;;  %v1056_v49 = vpop.f32.mrf.mxu0  ;;  %v1184_v50 = vpop.f32.mrf.mxu1 }
 0x187   : > { %v2149_v43 = vpack.c.bf16 %v1549_v32, %v1549_v32  ;;  %v1486_v45 = vadd.f32 %v2938_v29, %v1415_v34  ;;  %1283 = vst.msk [vmem:[#allocation2 + $0xf0] sm:$0xff] %vm259_vm0, %v1219_v40  ;;  %1315 = vst.msk [vmem:[#allocation2 + $0x1f0] sm:$0xff] %vm259_vm0, %v1251_v41 }
 0x188   : > { %v2181_v44 = vpack.c.bf16 %v1581_v33, %v1581_v33  ;;  %v1518_v46 = vadd.f32 %v2938_v29, %v1447_v35  ;;  %v1345_v47 = vld [vmem:[#allocation2 + $0xe0] sm:$0xff]  ;;  %v1057_v56 = vpop.f32.mrf.mxu0  ;;  %v1185_v57 = vpop.f32.mrf.mxu1 }
 0x189   : > { %v1377_v48 = vld [vmem:[#allocation2 + $0x1e0] sm:$0xff]  ;;  %v1416_v52 = vmul.f32 %v2929_v21, %v1345_v47  ;;  %1870 = vst.msk [vmem:[%s2708_s16 + $0x68] sm:$0xf] %vm1843_vm1, %v2149_v43  ;;  %v1550_v54 = vmax.f32 %v1486_v45, 0.0  ;;  %v1220_v60 = vadd.f32 %v1057_v56, %v419_v42  ;;  %v1252_v61 = vadd.f32 %v1185_v57, %v451_v51 }
 0x18a   : > { %v1448_v53 = vmul.f32 %v2929_v21, %v1377_v48  ;;  %1902 = vst.msk [vmem:[%s2708_s16 + $0xe8] sm:$0xf] %vm1843_vm1, %v2181_v44  ;;  %v1582_v55 = vmax.f32 %v1518_v46, 0.0  ;;  %v1346_v0 = vld [vmem:[#allocation2 + $0xe8] sm:$0xff]  ;;  %v1059_v2 = vpop.f32.mrf.mxu0  ;;  %v1187_v3 = vpop.f32.mrf.mxu1 }
 0x18b   : > { %v1487_v58 = vadd.f32 %v2938_v29, %v1416_v52  ;;  %v2150_v62 = vpack.c.bf16 %v1550_v54, %v1550_v54  ;;  %v1378_v1 = vld [vmem:[#allocation2 + $0x1e8] sm:$0xff]  ;;  %v1417_v6 = vmul.f32 %v2929_v21, %v1346_v0  ;;  %1284 = vst.msk [vmem:[#allocation2 + $0xf8] sm:$0xff] %vm259_vm0, %v1220_v60  ;;  %1316 = vst.msk [vmem:[#allocation2 + $0x1f8] sm:$0xff] %vm259_vm0, %v1252_v61 }
 0x18c   : > { %v1519_v59 = vadd.f32 %v2938_v29, %v1448_v53  ;;  %v2182_v63 = vpack.c.bf16 %v1582_v55, %v1582_v55  ;;  %v1449_v7 = vmul.f32 %v2929_v21, %v1378_v1 }
 0x18d   : > { %v1551_v4 = vmax.f32 %v1487_v58, 0.0  ;;  %1871 = vst.msk [vmem:[%s2708_s16 + $0x6c] sm:$0xf] %vm1843_vm1, %v2150_v62  ;;  %v1488_v10 = vadd.f32 %v2938_v29, %v1417_v6 }
 0x18e   : > { %v1583_v5 = vmax.f32 %v1519_v59, 0.0  ;;  %1903 = vst.msk [vmem:[%s2708_s16 + $0xec] sm:$0xf] %vm1843_vm1, %v2182_v63  ;;  %v1520_v11 = vadd.f32 %v2938_v29, %v1449_v7  ;;  %v1347_v12 = vld [vmem:[#allocation2 + $0xf0] sm:$0xff] }
 0x18f   : > { %v2151_v8 = vpack.c.bf16 %v1551_v4, %v1551_v4  ;;  %v1379_v36 = vld [vmem:[#allocation2 + $0x1f0] sm:$0xff]  ;;  %v1552_v13 = vmax.f32 %v1488_v10, 0.0  ;;  %v1418_v15 = vmul.f32 %v2929_v21, %v1347_v12 }
 0x190   : > { %v2183_v9 = vpack.c.bf16 %v1583_v5, %v1583_v5  ;;  %v1584_v14 = vmax.f32 %v1520_v11, 0.0  ;;  %v1450_v16 = vmul.f32 %v2929_v21, %v1379_v36 }
 0x191   : > { %1872 = vst.msk [vmem:[%s2708_s16 + $0x70] sm:$0xf] %vm1843_vm1, %v2151_v8  ;;  %v2152_v17 = vpack.c.bf16 %v1552_v13, %v1552_v13  ;;  %v1489_v19 = vadd.f32 %v2938_v29, %v1418_v15 }
 0x192   : > { %1904 = vst.msk [vmem:[%s2708_s16 + $0xf0] sm:$0xf] %vm1843_vm1, %v2183_v9  ;;  %v2184_v18 = vpack.c.bf16 %v1584_v14, %v1584_v14  ;;  %v1521_v20 = vadd.f32 %v2938_v29, %v1450_v16  ;;  %v1348_v22 = vld [vmem:[#allocation2 + $0xf8] sm:$0xff] }
 0x193   : > { %v1380_v39 = vld [vmem:[#allocation2 + $0x1f8] sm:$0xff]  ;;  %1873 = vst.msk [vmem:[%s2708_s16 + $0x74] sm:$0xf] %vm1843_vm1, %v2152_v17  ;;  %v1553_v23 = vmax.f32 %v1489_v19, 0.0  ;;  %v1419_v25 = vmul.f32 %v2929_v21, %v1348_v22 }
 0x194   : > { %1905 = vst.msk [vmem:[%s2708_s16 + $0xf4] sm:$0xf] %vm1843_vm1, %v2184_v18  ;;  %v1585_v24 = vmax.f32 %v1521_v20, 0.0  ;;  %v1451_v26 = vmul.f32 %v2929_v21, %v1380_v39 }
 0x195   : > { %v2153_v27 = vpack.c.bf16 %v1553_v23, %v1553_v23  ;;  %v1490_v30 = vadd.f32 %v2938_v29, %v1419_v25 }
 0x196   : > { %v2185_v28 = vpack.c.bf16 %v1585_v24, %v1585_v24  ;;  %v1522_v31 = vadd.f32 %v2938_v29, %v1451_v26 }
 0x197   : > { %1874 = vst.msk [vmem:[%s2708_s16 + $0x78] sm:$0xf] %vm1843_vm1, %v2153_v27  ;;  %v1554_v32 = vmax.f32 %v1490_v30, 0.0 }
 0x198   : > { %1906 = vst.msk [vmem:[%s2708_s16 + $0xf8] sm:$0xf] %vm1843_vm1, %v2185_v28  ;;  %v1586_v33 = vmax.f32 %v1522_v31, 0.0 }
 0x199   : > { %v2154_v34 = vpack.c.bf16 %v1554_v32, %v1554_v32 }
 0x19a   : > { %v2186_v35 = vpack.c.bf16 %v1586_v33, %v1586_v33 }
 0x19b   : > { %1875 = vst.msk [vmem:[%s2708_s16 + $0x7c] sm:$0xf] %vm1843_vm1, %v2154_v34 }
 0x19c   : > { %1907 = vst.msk [vmem:[%s2708_s16 + $0xfc] sm:$0xf] %vm1843_vm1, %v2186_v35 }
 0x19d PF: > { %s16_s21 = sadd.s32 1, %s2349_s21  }
 0x19e   : > { %p13_p4 = scmp.ge.s32.totalorder %s16_s21, 51  }
 0x1a0   :  { %15 = sbr.rel (!%p13_p4) target bundleno = 1 (0x1), region = 74 }

</bundles_post_ra>
